<compile_context>
chip_gen: v6e
topology: v6e:2x2x1
jax: 0.10.0
libtpu: 0.0.40
codegen_flags: <defaults>
</compile_context>

<pallas_src>
import functools
import math

import jax
import jax.numpy as jnp
from jax.experimental import pallas as pl
from jax.experimental.pallas import tpu as pltpu


# --------------------------------------------------------------------------
# Generation-aware VMEM budget + single-buffering probe
# --------------------------------------------------------------------------

def _vmem_capacity_bytes():
    try:
        return int(pltpu.get_tpu_info().vmem_capacity_bytes)
    except Exception:
        return 64 * 1024 * 1024  # conservative default = v7x per-TC VMEM


_VMEM_CAP = _vmem_capacity_bytes()
# v5e/v6e (128 MiB physical) -> 64 MiB limit; v7x (64 MiB) -> 32 MiB limit.
_VMEM_LIMIT = min(_VMEM_CAP // 2, 64 * 1024 * 1024)


def _cparams(n_axes):
    return pltpu.CompilerParams(
        dimension_semantics=("parallel",) * n_axes,
        vmem_limit_bytes=_VMEM_LIMIT,
    )


def _copy_kernel(x_ref, o_ref):
    o_ref[...] = x_ref[...]


def _probe_single_buffer():
    """Check (with a tiny on-device kernel) that Buffered(1) is usable."""
    try:
        mode = pl.Buffered(1)
        f = pl.pallas_call(
            _copy_kernel,
            out_shape=jax.ShapeDtypeStruct((8, 128), jnp.float32),
            grid_spec=pltpu.PrefetchScalarGridSpec(
                num_scalar_prefetch=0,
                grid=(1,),
                in_specs=[pl.BlockSpec((8, 128), lambda i: (0, 0),
                                       pipeline_mode=mode)],
                out_specs=pl.BlockSpec((8, 128), lambda i: (0, 0)),
            ),
            compiler_params=_cparams(1),
        )
        jax.block_until_ready(f(jnp.zeros((8, 128), jnp.float32)))
        return mode
    except Exception:
        return None


_SINGLE_BUF = _probe_single_buffer()


def _const_spec(shape):
    """BlockSpec for an operand whose block index never changes (weights etc.).

    Single-buffered when supported: the default double buffer would just hold a
    second copy of the weight in VMEM for no benefit (critical on v7x's 64 MiB).
    """
    idx = lambda *_: (0,) * len(shape)
    if _SINGLE_BUF is not None:
        return pl.BlockSpec(shape, idx, pipeline_mode=_SINGLE_BUF)
    return pl.BlockSpec(shape, idx)


# --------------------------------------------------------------------------
# Tiling helpers
# --------------------------------------------------------------------------

def _plan_rows(rows, feat_in, feat_out, row_feats=None):
    """Row tile (multiple of 8) + padded row count, sized against _VMEM_LIMIT.

    Constant operands (weights/biases) are counted single- or double-buffered
    depending on Buffered(1) support; row tiles are double-buffered by the
    Pallas pipeline. Rows are padded up to a tile multiple (hardening against
    unfriendly B*N values).
    """
    if row_feats is None:
        row_feats = feat_in + feat_out
    const_bufs = 1 if _SINGLE_BUF is not None else 2
    const_bytes = 4 * (feat_in * feat_out + 2 * feat_in + feat_out) * const_bufs
    per_row_bytes = 4 * row_feats * 2  # double-buffered row-tiled operands
    avail = max(_VMEM_LIMIT // 2 - const_bytes, 8 * per_row_bytes)
    tm = min(1024, max(8, (avail // per_row_bytes) // 8 * 8))
    if rows <= tm:
        tm = -(-rows // 8) * 8
        return tm, tm
    padded = -(-rows // tm) * tm
    return tm, padded


def _pad_rows(x, padded):
    r = x.shape[0]
    if padded == r:
        return x
    return jnp.pad(x, ((0, padded - r),) + ((0, 0),) * (x.ndim - 1))


_GELU_C = math.sqrt(2.0 / math.pi)


def _gelu_tanh(x):
    # TODO(synk): PyTorch nn.GELU() defaults to the exact erf form; the tanh
    # approximation is used (kernel and in-script reference) to stay on ops
    # guaranteed to lower in Mosaic.
    return 0.5 * x * (1.0 + jnp.tanh(_GELU_C * (x + 0.044715 * x * x * x)))


def _mxu_dot(a, b):
    """bf16 MXU inputs, f32 accumulation (v6e/v7x bf16 peak, half the DMA bytes)."""
    return jnp.dot(a.astype(jnp.bfloat16), b.astype(jnp.bfloat16),
                   preferred_element_type=jnp.float32)


# --------------------------------------------------------------------------
# Kernels
# --------------------------------------------------------------------------

def _ln_matmul_kernel(x_ref, g_ref, bta_ref, w_ref, b_ref, out_ref, *, eps, activation):
    # Fused LayerNorm -> Linear (-> optional GELU) on a (TM, E) row tile.
    x = x_ref[...].astype(jnp.float32)
    mu = jnp.mean(x, axis=-1, keepdims=True)
    xc = x - mu
    var = jnp.mean(xc * xc, axis=-1, keepdims=True)
    xn = xc * jax.lax.rsqrt(var + eps)
    xn = xn * g_ref[...] + bta_ref[...]
    acc = _mxu_dot(xn, w_ref[...]) + b_ref[...]
    if activation == "gelu":
        acc = _gelu_tanh(acc)
    out_ref[...] = acc.astype(out_ref.dtype)


def _matmul_bias_add_kernel(x_ref, w_ref, b_ref, r_ref, out_ref):
    # Fused Linear + bias + elementwise add (residual or positional encoding).
    acc = _mxu_dot(x_ref[...], w_ref[...])
    out_ref[...] = (acc + b_ref[...] + r_ref[...].astype(jnp.float32)).astype(out_ref.dtype)


def _attn_proj_residual_kernel(qkv_ref, res_ref, pw_ref, pb_ref, out_ref,
                               *, heads, hd, scale):
    # One batch image per grid step; all heads inside the kernel so the output
    # block is lane-dense (last dim = E). Fuses head-merge + projection + residual.
    E = heads * hd
    qkv = qkv_ref[0]                                    # (N, 3E), f32
    pw = pw_ref[...]                                    # (E, E)
    acc = res_ref[0].astype(jnp.float32) + pb_ref[...]  # residual + proj bias, (N, E)
    for h in range(heads):                              # static unroll over heads
        q = qkv[:, h * hd:(h + 1) * hd].astype(jnp.float32) * scale  # pre-scale q
        k = qkv[:, E + h * hd:E + (h + 1) * hd]
        v = qkv[:, 2 * E + h * hd:2 * E + (h + 1) * hd]
        # NT matmul: contract last dims of both operands, no explicit k transpose.
        s = jax.lax.dot_general(
            q.astype(jnp.bfloat16), k.astype(jnp.bfloat16),
            dimension_numbers=(((1,), (1,)), ((), ())),
            preferred_element_type=jnp.float32)          # (N, N)
        m = jnp.max(s, axis=-1, keepdims=True)
        p = jnp.exp(s - m)
        denom = jnp.sum(p, axis=-1, keepdims=True)
        p = p * pl.reciprocal(denom, approx=True)        # divide on the EUP slot
        o = _mxu_dot(p, v)                               # (N, hd)
        # Concat-free head merge: (concat_h o_h) @ Wp == sum_h o_h @ Wp[h*hd:(h+1)*hd]
        acc = acc + _mxu_dot(o, pw[h * hd:(h + 1) * hd, :])
    out_ref[0] = acc.astype(out_ref.dtype)


# --------------------------------------------------------------------------
# pallas_call wrappers
# --------------------------------------------------------------------------

def ln_matmul(x, gamma, beta, w, b, *, activation=None, eps=1e-5):
    """Fused LayerNorm + Linear (+ optional GELU). x: [R, E] -> [R, F]."""
    R, E = x.shape
    F = w.shape[1]
    tm, padded = _plan_rows(R, E, F)
    xp = _pad_rows(x, padded)
    kern = functools.partial(_ln_matmul_kernel, eps=eps, activation=activation)
    out = pl.pallas_call(
        kern,
        out_shape=jax.ShapeDtypeStruct((padded, F), x.dtype),
        grid_spec=pltpu.PrefetchScalarGridSpec(
            num_scalar_prefetch=0,
            grid=(padded // tm,),
            in_specs=[
                pl.BlockSpec((tm, E), lambda i: (i, 0)),
                _const_spec((1, E)),
                _const_spec((1, E)),
                _const_spec((E, F)),
                _const_spec((1, F)),
            ],
            out_specs=pl.BlockSpec((tm, F), lambda i: (i, 0)),
        ),
        compiler_params=_cparams(1),
    )(xp, gamma, beta, w, b)
    return out[:R] if padded != R else out


def matmul_bias_add(x, w, b, addend):
    """Fused Linear + bias + elementwise add. x: [R, Fin], addend: [R, Fout]."""
    R, Fin = x.shape
    Fout = w.shape[1]
    tm, padded = _plan_rows(R, Fin, Fout, row_feats=Fin + 2 * Fout)
    xp = _pad_rows(x, padded)
    ap = _pad_rows(addend, padded)
    out = pl.pallas_call(
        _matmul_bias_add_kernel,
        out_shape=jax.ShapeDtypeStruct((padded, Fout), x.dtype),
        grid_spec=pltpu.PrefetchScalarGridSpec(
            num_scalar_prefetch=0,
            grid=(padded // tm,),
            in_specs=[
                pl.BlockSpec((tm, Fin), lambda i: (i, 0)),
                _const_spec((Fin, Fout)),
                _const_spec((1, Fout)),
                pl.BlockSpec((tm, Fout), lambda i: (i, 0)),
            ],
            out_specs=pl.BlockSpec((tm, Fout), lambda i: (i, 0)),
        ),
        compiler_params=_cparams(1),
    )(xp, w, b, ap)
    return out[:R] if padded != R else out


def attention_block(qkv, residual, proj_w, proj_b, *, heads, head_dim):
    """qkv: [B, N, 3E], residual: [B, N, E] -> [B, N, E] (proj + residual fused)."""
    B, N, E3 = qkv.shape
    E = heads * head_dim
    assert E3 == 3 * E
    kern = functools.partial(_attn_proj_residual_kernel, heads=heads, hd=head_dim,
                             scale=head_dim ** -0.5)
    return pl.pallas_call(
        kern,
        out_shape=jax.ShapeDtypeStruct((B, N, E), qkv.dtype),
        grid_spec=pltpu.PrefetchScalarGridSpec(
            num_scalar_prefetch=0,
            grid=(B,),
            in_specs=[
                pl.BlockSpec((1, N, E3), lambda i: (i, 0, 0)),
                pl.BlockSpec((1, N, E), lambda i: (i, 0, 0)),
                _const_spec((E, E)),
                _const_spec((1, E)),
            ],
            out_specs=pl.BlockSpec((1, N, E), lambda i: (i, 0, 0)),
        ),
        compiler_params=_cparams(1),
    )(qkv, residual, proj_w, proj_b)


# --------------------------------------------------------------------------
# Full MyVIT2D forward (Pallas kernels + free reshapes in the wrapper)
# --------------------------------------------------------------------------

def vit_forward(params, x, cfg):
    B, C, H, W = x.shape
    ph, pw = cfg["patch_size"]
    nH, nW = H // ph, W // pw
    N = nH * nW
    E = cfg["embed_dim"]
    heads = cfg["num_heads"]
    hd = E // heads
    R = B * N

    # Conv2d(kernel=stride=patch) == patch extraction (reshape/transpose) + matmul.
    patches = x.reshape(B, C, nH, ph, nW, pw)
    patches = patches.transpose(0, 2, 4, 1, 3, 5).reshape(R, C * ph * pw)

    # Patch projection with conv bias AND positional encoding fused in the epilogue.
    pos_rows = jnp.broadcast_to(params["pos"][None], (B, N, E)).reshape(R, E)
    h = matmul_bias_add(patches, params["patch_w"], params["patch_b"], pos_rows)

    for lp in params["layers"]:
        # --- attention block:  h = h + proj(MHSA(LN1(h))) ---
        qkv = ln_matmul(h, lp["ln1_g"], lp["ln1_b"], lp["qkv_w"], lp["qkv_b"])
        h = attention_block(qkv.reshape(B, N, 3 * E), h.reshape(B, N, E),
                            lp["proj_w"], lp["proj_b"], heads=heads, head_dim=hd)
        h = h.reshape(R, E)

        # --- MLP block:  h = h + fc2(gelu(fc1(LN2(h)))) ---
        hidden = ln_matmul(h, lp["ln2_g"], lp["ln2_b"], lp["fc1_w"], lp["fc1_b"],
                           activation="gelu")
        h = matmul_bias_add(hidden, lp["fc2_w"], lp["fc2_b"], h)
        # nn.Dropout is identity at inference time; omitted.

    # Final LayerNorm fused with the reconstruction Linear.
    out = ln_matmul(h, params["ln_g"], params["ln_b"], params["rec_w"], params["rec_b"])
    # Matches torch's `x.view(B, C, H, W)` on a contiguous [B, N, C*ph*pw] tensor.
    return out.reshape(B, C, H, W)


# --------------------------------------------------------------------------
# Pure-JAX reference (f32 math) for the correctness check
# --------------------------------------------------------------------------

def _layer_norm_ref(x, g, b, eps=1e-5):
    mu = jnp.mean(x, axis=-1, keepdims=True)
    var = jnp.mean((x - mu) ** 2, axis=-1, keepdims=True)
    return (x - mu) * jax.lax.rsqrt(var + eps) * g + b


def vit_forward_ref(params, x, cfg):
    B, C, H, W = x.shape
    ph, pw = cfg["patch_size"]
    nH, nW = H // ph, W // pw
    N = nH * nW
    E = cfg["embed_dim"]
    heads = cfg["num_heads"]
    hd = E // heads

    patches = x.reshape(B, C, nH, ph, nW, pw).transpose(0, 2, 4, 1, 3, 5)
    patches = patches.reshape(B, N, C * ph * pw)
    h = patches @ params["patch_w"] + params["patch_b"] + params["pos"]

    for lp in params["layers"]:
        y = _layer_norm_ref(h, lp["ln1_g"], lp["ln1_b"])
        qkv = y @ lp["qkv_w"] + lp["qkv_b"]
        qkv = qkv.reshape(B, N, 3, heads, hd).transpose(2, 0, 3, 1, 4)
        q, k, v = qkv[0], qkv[1], qkv[2]
        s = jnp.einsum("bhnd,bhmd->bhnm", q, k) * (hd ** -0.5)
        p = jax.nn.softmax(s, axis=-1)
        o = jnp.einsum("bhnm,bhmd->bhnd", p, v)
        o = o.transpose(0, 2, 1, 3).reshape(B, N, E)
        h = h + (o @ lp["proj_w"] + lp["proj_b"])
        y = _layer_norm_ref(h, lp["ln2_g"], lp["ln2_b"])
        z = _gelu_tanh(y @ lp["fc1_w"] + lp["fc1_b"])
        h = h + (z @ lp["fc2_w"] + lp["fc2_b"])

    h = _layer_norm_ref(h, params["ln_g"], params["ln_b"])
    out = h @ params["rec_w"] + params["rec_b"]
    return out.reshape(B, C, H, W)


# --------------------------------------------------------------------------
# Parameter init + demo
# --------------------------------------------------------------------------

def init_params(key, cfg):
    C = cfg["in_channels"]
    ph, pw = cfg["patch_size"]
    E = cfg["embed_dim"]
    mlp = cfg["mlp_dim"]
    depth = cfg["depth"]
    N = cfg["num_patches"]
    K = C * ph * pw

    def linear(k, fan_in, fan_out):
        kw, _ = jax.random.split(k)
        w = jax.random.normal(kw, (fan_in, fan_out), jnp.float32) / math.sqrt(fan_in)
        b = jnp.zeros((1, fan_out), jnp.float32)
        return w, b

    keys = jax.random.split(key, depth + 3)
    patch_w, patch_b = linear(keys[0], K, E)
    pos = jax.random.normal(keys[1], (N, E), jnp.float32)

    layers = []
    for d in range(depth):
        k = jax.random.split(keys[2 + d], 4)
        qkv_w, qkv_b = linear(k[0], E, 3 * E)
        proj_w, proj_b = linear(k[1], E, E)
        fc1_w, fc1_b = linear(k[2], E, mlp)
        fc2_w, fc2_b = linear(k[3], mlp, E)
        layers.append(dict(
            ln1_g=jnp.ones((1, E), jnp.float32), ln1_b=jnp.zeros((1, E), jnp.float32),
            qkv_w=qkv_w, qkv_b=qkv_b, proj_w=proj_w, proj_b=proj_b,
            ln2_g=jnp.ones((1, E), jnp.float32), ln2_b=jnp.zeros((1, E), jnp.float32),
            fc1_w=fc1_w, fc1_b=fc1_b, fc2_w=fc2_w, fc2_b=fc2_b,
        ))

    rec_w, rec_b = linear(keys[2 + depth], E, K)
    return dict(
        patch_w=patch_w, patch_b=patch_b, pos=pos, layers=layers,
        ln_g=jnp.ones((1, E), jnp.float32), ln_b=jnp.zeros((1, E), jnp.float32),
        rec_w=rec_w, rec_b=rec_b,
    )


if __name__ == "__main__":
    cfg = dict(
        img_size=(16, 16), patch_size=(4, 4), in_channels=4,
        embed_dim=32, num_heads=4, mlp_dim=64, depth=2,
    )
    cfg["num_patches"] = (cfg["img_size"][0] // cfg["patch_size"][0]) * \
                         (cfg["img_size"][1] // cfg["patch_size"][1])

    B = 2
    key = jax.random.PRNGKey(0)
    kp, kx = jax.random.split(key)
    params = init_params(kp, cfg)
    x = jax.random.normal(kx, (B, cfg["in_channels"], *cfg["img_size"]), jnp.float32)

    fwd = jax.jit(lambda p, xi: vit_forward(p, xi, cfg))
    out = jax.block_until_ready(fwd(params, x))

    ref = jax.block_until_ready(vit_forward_ref(params, x, cfg))

    assert out.shape == x.shape, (out.shape, x.shape)
    assert bool(jnp.all(jnp.isfinite(out))), "non-finite values in kernel output"
    err = float(jnp.max(jnp.abs(out - ref)))
    scale = float(jnp.max(jnp.abs(ref))) + 1e-6
    # Tolerance covers bf16 MXU inputs + approx reciprocal vs the f32 reference.
    assert err / scale < 5e-2, f"mismatch vs reference: rel err {err / scale:.3e}"

    print("KERNEL_OK")
</pallas_src>

<mosaic_0001>
module attributes {stable_mosaic.version = 11 : i64} {
  func.func @_copy_kernel(%arg0: i32, %arg1: memref<8x128xf32, #tpu.memory_space<vmem>>, %arg2: memref<8x128xf32, #tpu.memory_space<vmem>>) attributes {dimension_semantics = [#tpu.dimension_semantics<parallel>], iteration_bounds = array<i64: 1>, scalar_prefetch = 0 : i64, scratch_operands = 0 : i64, tpu.core_type = #tpu.core_type<tc>, window_params = [{pipeline_mode = #tpu.pipeline_mode<synchronous>, transform_indices = @transform_0, window_bounds = array<i64: 8, 128>}, {pipeline_mode = #tpu.pipeline_mode<synchronous>, transform_indices = @transform_1, window_bounds = array<i64: 8, 128>}]} {
    %c0 = arith.constant 0 : index
    %c0_0 = arith.constant 0 : index
    %0 = vector.load %arg1[%c0, %c0_0] : memref<8x128xf32, #tpu.memory_space<vmem>>, vector<8x128xf32>
    %c0_1 = arith.constant 0 : index
    %c0_2 = arith.constant 0 : index
    %1 = vector.load %arg2[%c0_1, %c0_2] : memref<8x128xf32, #tpu.memory_space<vmem>>, vector<8x128xf32>
    tpu.vector_store %arg2[%c0_1, %c0_2], %0 {strides = array<i32>} : memref<8x128xf32, #tpu.memory_space<vmem>>, vector<8x128xf32>,
    return
  }
  func.func @transform_0(%arg0: i32) -> (i32, i32) {
    %c0_i32 = arith.constant 0 : i32
    %c0_i32_0 = arith.constant 0 : i32
    %c0_i32_1 = arith.constant 0 : i32
    return %c0_i32, %c0_i32_0 : i32, i32
  }
  func.func @transform_1(%arg0: i32) -> (i32, i32) {
    %c0_i32 = arith.constant 0 : i32
    %c0_i32_0 = arith.constant 0 : i32
    %c0_i32_1 = arith.constant 0 : i32
    return %c0_i32, %c0_i32_0 : i32, i32
  }
}

module attributes {stable_mosaic.version = 11 : i64} {
  func.func @_attn_proj_residual_kernel(%arg0: i32, %arg1: memref<1x16x96xf32, #tpu.memory_space<vmem>>, %arg2: memref<1x16x32xf32, #tpu.memory_space<vmem>>, %arg3: memref<32x32xf32, #tpu.memory_space<vmem>>, %arg4: memref<1x32xf32, #tpu.memory_space<vmem>>, %arg5: memref<1x16x32xf32, #tpu.memory_space<vmem>>) attributes {dimension_semantics = [#tpu.dimension_semantics<parallel>], iteration_bounds = array<i64: 2>, scalar_prefetch = 0 : i64, scratch_operands = 0 : i64, tpu.core_type = #tpu.core_type<tc>, window_params = [{transform_indices = @transform_0, window_bounds = array<i64: 1, 16, 96>}, {transform_indices = @transform_1, window_bounds = array<i64: 1, 16, 32>}, {pipeline_mode = #tpu.pipeline_mode<synchronous>, transform_indices = @transform_2, window_bounds = array<i64: 32, 32>}, {pipeline_mode = #tpu.pipeline_mode<synchronous>, transform_indices = @transform_3, window_bounds = array<i64: 1, 32>}, {transform_indices = @transform_4, window_bounds = array<i64: 1, 16, 32>}]} {
    %c0 = arith.constant 0 : index
    %c0_0 = arith.constant 0 : index
    %c0_1 = arith.constant 0 : index
    %0 = vector.load %arg1[%c0, %c0_0, %c0_1] : memref<1x16x96xf32, #tpu.memory_space<vmem>>, vector<1x16x96xf32>
    %1 = vector.shape_cast %0 : vector<1x16x96xf32> to vector<16x96xf32>
    %c0_2 = arith.constant 0 : index
    %c0_3 = arith.constant 0 : index
    %2 = vector.load %arg3[%c0_2, %c0_3] : memref<32x32xf32, #tpu.memory_space<vmem>>, vector<32x32xf32>
    %c0_4 = arith.constant 0 : index
    %c0_5 = arith.constant 0 : index
    %c0_6 = arith.constant 0 : index
    %3 = vector.load %arg2[%c0_4, %c0_5, %c0_6] : memref<1x16x32xf32, #tpu.memory_space<vmem>>, vector<1x16x32xf32>
    %4 = vector.shape_cast %3 : vector<1x16x32xf32> to vector<16x32xf32>
    %c0_7 = arith.constant 0 : index
    %c0_8 = arith.constant 0 : index
    %5 = vector.load %arg4[%c0_7, %c0_8] : memref<1x32xf32, #tpu.memory_space<vmem>>, vector<1x32xf32>
    %6 = vector.broadcast %5 : vector<1x32xf32> to vector<16x32xf32>
    %7 = arith.addf %4, %6 : vector<16x32xf32>
    %8 = vector.extract_strided_slice %1 {offsets = [0, 0], sizes = [16, 8], strides = [1, 1]} : vector<16x96xf32> to vector<16x8xf32>
    %cst = arith.constant 0.353553385 : f32
    %9 = vector.broadcast %cst : f32 to vector<16x8xf32>
    %10 = arith.mulf %8, %9 : vector<16x8xf32>
    %11 = vector.extract_strided_slice %1 {offsets = [0, 32], sizes = [16, 8], strides = [1, 1]} : vector<16x96xf32> to vector<16x8xf32>
    %12 = vector.extract_strided_slice %1 {offsets = [0, 64], sizes = [16, 8], strides = [1, 1]} : vector<16x96xf32> to vector<16x8xf32>
    %13 = arith.truncf %10 : vector<16x8xf32> to vector<16x8xbf16>
    %14 = arith.truncf %11 : vector<16x8xf32> to vector<16x8xbf16>
    %cst_9 = arith.constant dense<0.000000e+00> : vector<16x16xf32>
    %15 = tpu.matmul %13, %14, %cst_9 {dimension_numbers = #tpu.dot_dimension_numbers<[1], [1], [0], [0], [0, 0, 1, 0], [], []>} : vector<16x8xbf16>, vector<16x8xbf16>, vector<16x16xf32> -> vector<16x16xf32>
    %cst_10 = arith.constant dense<0xFF800000> : vector<16xf32>
    %16 = vector.multi_reduction <maximumf>, %15, %cst_10 [1] : vector<16x16xf32> to vector<16xf32>
    %17 = vector.shape_cast %16 : vector<16xf32> to vector<16x1xf32>
    %18 = vector.broadcast %17 : vector<16x1xf32> to vector<16x16xf32>
    %19 = arith.subf %15, %18 : vector<16x16xf32>
    %20 = math.exp %19 : vector<16x16xf32>
    %cst_11 = arith.constant dense<0.000000e+00> : vector<16xf32>
    %21 = vector.multi_reduction <add>, %20, %cst_11 [1] : vector<16x16xf32> to vector<16xf32>
    %22 = vector.shape_cast %21 : vector<16xf32> to vector<16x1xf32>
    %23 = tpu.reciprocal %22 {approx = true} : vector<16x1xf32> -> vector<16x1xf32>
    %24 = vector.broadcast %23 : vector<16x1xf32> to vector<16x16xf32>
    %25 = arith.mulf %20, %24 : vector<16x16xf32>
    %26 = arith.truncf %25 : vector<16x16xf32> to vector<16x16xbf16>
    %27 = arith.truncf %12 : vector<16x8xf32> to vector<16x8xbf16>
    %cst_12 = arith.constant dense<0.000000e+00> : vector<16x8xf32>
    %28 = tpu.matmul %26, %27, %cst_12 {dimension_numbers = #tpu.dot_dimension_numbers<[1], [0], [0], [1], [0, 0, 1, 1], [], []>} : vector<16x16xbf16>, vector<16x8xbf16>, vector<16x8xf32> -> vector<16x8xf32>
    %29 = vector.extract_strided_slice %2 {offsets = [0, 0], sizes = [8, 32], strides = [1, 1]} : vector<32x32xf32> to vector<8x32xf32>
    %30 = arith.truncf %28 : vector<16x8xf32> to vector<16x8xbf16>
    %31 = arith.truncf %29 : vector<8x32xf32> to vector<8x32xbf16>
    %cst_13 = arith.constant dense<0.000000e+00> : vector<16x32xf32>
    %32 = tpu.matmul %30, %31, %cst_13 {dimension_numbers = #tpu.dot_dimension_numbers<[1], [0], [0], [1], [0, 0, 1, 1], [], []>} : vector<16x8xbf16>, vector<8x32xbf16>, vector<16x32xf32> -> vector<16x32xf32>
    %33 = arith.addf %7, %32 : vector<16x32xf32>
    %34 = vector.extract_strided_slice %1 {offsets = [0, 8], sizes = [16, 8], strides = [1, 1]} : vector<16x96xf32> to vector<16x8xf32>
    %cst_14 = arith.constant 0.353553385 : f32
    %35 = vector.broadcast %cst_14 : f32 to vector<16x8xf32>
    %36 = arith.mulf %34, %35 : vector<16x8xf32>
    %37 = vector.extract_strided_slice %1 {offsets = [0, 40], sizes = [16, 8], strides = [1, 1]} : vector<16x96xf32> to vector<16x8xf32>
    %38 = vector.extract_strided_slice %1 {offsets = [0, 72], sizes = [16, 8], strides = [1, 1]} : vector<16x96xf32> to vector<16x8xf32>
    %39 = arith.truncf %36 : vector<16x8xf32> to vector<16x8xbf16>
    %40 = arith.truncf %37 : vector<16x8xf32> to vector<16x8xbf16>
    %cst_15 = arith.constant dense<0.000000e+00> : vector<16x16xf32>
    %41 = tpu.matmul %39, %40, %cst_15 {dimension_numbers = #tpu.dot_dimension_numbers<[1], [1], [0], [0], [0, 0, 1, 0], [], []>} : vector<16x8xbf16>, vector<16x8xbf16>, vector<16x16xf32> -> vector<16x16xf32>
    %cst_16 = arith.constant dense<0xFF800000> : vector<16xf32>
    %42 = vector.multi_reduction <maximumf>, %41, %cst_16 [1] : vector<16x16xf32> to vector<16xf32>
    %43 = vector.shape_cast %42 : vector<16xf32> to vector<16x1xf32>
    %44 = vector.broadcast %43 : vector<16x1xf32> to vector<16x16xf32>
    %45 = arith.subf %41, %44 : vector<16x16xf32>
    %46 = math.exp %45 : vector<16x16xf32>
    %cst_17 = arith.constant dense<0.000000e+00> : vector<16xf32>
    %47 = vector.multi_reduction <add>, %46, %cst_17 [1] : vector<16x16xf32> to vector<16xf32>
    %48 = vector.shape_cast %47 : vector<16xf32> to vector<16x1xf32>
    %49 = tpu.reciprocal %48 {approx = true} : vector<16x1xf32> -> vector<16x1xf32>
    %50 = vector.broadcast %49 : vector<16x1xf32> to vector<16x16xf32>
    %51 = arith.mulf %46, %50 : vector<16x16xf32>
    %52 = arith.truncf %51 : vector<16x16xf32> to vector<16x16xbf16>
    %53 = arith.truncf %38 : vector<16x8xf32> to vector<16x8xbf16>
    %cst_18 = arith.constant dense<0.000000e+00> : vector<16x8xf32>
    %54 = tpu.matmul %52, %53, %cst_18 {dimension_numbers = #tpu.dot_dimension_numbers<[1], [0], [0], [1], [0, 0, 1, 1], [], []>} : vector<16x16xbf16>, vector<16x8xbf16>, vector<16x8xf32> -> vector<16x8xf32>
    %55 = vector.extract_strided_slice %2 {offsets = [8, 0], sizes = [8, 32], strides = [1, 1]} : vector<32x32xf32> to vector<8x32xf32>
    %56 = arith.truncf %54 : vector<16x8xf32> to vector<16x8xbf16>
    %57 = arith.truncf %55 : vector<8x32xf32> to vector<8x32xbf16>
    %cst_19 = arith.constant dense<0.000000e+00> : vector<16x32xf32>
    %58 = tpu.matmul %56, %57, %cst_19 {dimension_numbers = #tpu.dot_dimension_numbers<[1], [0], [0], [1], [0, 0, 1, 1], [], []>} : vector<16x8xbf16>, vector<8x32xbf16>, vector<16x32xf32> -> vector<16x32xf32>
    %59 = arith.addf %33, %58 : vector<16x32xf32>
    %60 = vector.extract_strided_slice %1 {offsets = [0, 16], sizes = [16, 8], strides = [1, 1]} : vector<16x96xf32> to vector<16x8xf32>
    %cst_20 = arith.constant 0.353553385 : f32
    %61 = vector.broadcast %cst_20 : f32 to vector<16x8xf32>
    %62 = arith.mulf %60, %61 : vector<16x8xf32>
    %63 = vector.extract_strided_slice %1 {offsets = [0, 48], sizes = [16, 8], strides = [1, 1]} : vector<16x96xf32> to vector<16x8xf32>
    %64 = vector.extract_strided_slice %1 {offsets = [0, 80], sizes = [16, 8], strides = [1, 1]} : vector<16x96xf32> to vector<16x8xf32>
    %65 = arith.truncf %62 : vector<16x8xf32> to vector<16x8xbf16>
    %66 = arith.truncf %63 : vector<16x8xf32> to vector<16x8xbf16>
    %cst_21 = arith.constant dense<0.000000e+00> : vector<16x16xf32>
    %67 = tpu.matmul %65, %66, %cst_21 {dimension_numbers = #tpu.dot_dimension_numbers<[1], [1], [0], [0], [0, 0, 1, 0], [], []>} : vector<16x8xbf16>, vector<16x8xbf16>, vector<16x16xf32> -> vector<16x16xf32>
    %cst_22 = arith.constant dense<0xFF800000> : vector<16xf32>
    %68 = vector.multi_reduction <maximumf>, %67, %cst_22 [1] : vector<16x16xf32> to vector<16xf32>
    %69 = vector.shape_cast %68 : vector<16xf32> to vector<16x1xf32>
    %70 = vector.broadcast %69 : vector<16x1xf32> to vector<16x16xf32>
    %71 = arith.subf %67, %70 : vector<16x16xf32>
    %72 = math.exp %71 : vector<16x16xf32>
    %cst_23 = arith.constant dense<0.000000e+00> : vector<16xf32>
    %73 = vector.multi_reduction <add>, %72, %cst_23 [1] : vector<16x16xf32> to vector<16xf32>
    %74 = vector.shape_cast %73 : vector<16xf32> to vector<16x1xf32>
    %75 = tpu.reciprocal %74 {approx = true} : vector<16x1xf32> -> vector<16x1xf32>
    %76 = vector.broadcast %75 : vector<16x1xf32> to vector<16x16xf32>
    %77 = arith.mulf %72, %76 : vector<16x16xf32>
    %78 = arith.truncf %77 : vector<16x16xf32> to vector<16x16xbf16>
    %79 = arith.truncf %64 : vector<16x8xf32> to vector<16x8xbf16>
    %cst_24 = arith.constant dense<0.000000e+00> : vector<16x8xf32>
    %80 = tpu.matmul %78, %79, %cst_24 {dimension_numbers = #tpu.dot_dimension_numbers<[1], [0], [0], [1], [0, 0, 1, 1], [], []>} : vector<16x16xbf16>, vector<16x8xbf16>, vector<16x8xf32> -> vector<16x8xf32>
    %81 = vector.extract_strided_slice %2 {offsets = [16, 0], sizes = [8, 32], strides = [1, 1]} : vector<32x32xf32> to vector<8x32xf32>
    %82 = arith.truncf %80 : vector<16x8xf32> to vector<16x8xbf16>
    %83 = arith.truncf %81 : vector<8x32xf32> to vector<8x32xbf16>
    %cst_25 = arith.constant dense<0.000000e+00> : vector<16x32xf32>
    %84 = tpu.matmul %82, %83, %cst_25 {dimension_numbers = #tpu.dot_dimension_numbers<[1], [0], [0], [1], [0, 0, 1, 1], [], []>} : vector<16x8xbf16>, vector<8x32xbf16>, vector<16x32xf32> -> vector<16x32xf32>
    %85 = arith.addf %59, %84 : vector<16x32xf32>
    %86 = vector.extract_strided_slice %1 {offsets = [0, 24], sizes = [16, 8], strides = [1, 1]} : vector<16x96xf32> to vector<16x8xf32>
    %cst_26 = arith.constant 0.353553385 : f32
    %87 = vector.broadcast %cst_26 : f32 to vector<16x8xf32>
    %88 = arith.mulf %86, %87 : vector<16x8xf32>
    %89 = vector.extract_strided_slice %1 {offsets = [0, 56], sizes = [16, 8], strides = [1, 1]} : vector<16x96xf32> to vector<16x8xf32>
    %90 = vector.extract_strided_slice %1 {offsets = [0, 88], sizes = [16, 8], strides = [1, 1]} : vector<16x96xf32> to vector<16x8xf32>
    %91 = arith.truncf %88 : vector<16x8xf32> to vector<16x8xbf16>
    %92 = arith.truncf %89 : vector<16x8xf32> to vector<16x8xbf16>
    %cst_27 = arith.constant dense<0.000000e+00> : vector<16x16xf32>
    %93 = tpu.matmul %91, %92, %cst_27 {dimension_numbers = #tpu.dot_dimension_numbers<[1], [1], [0], [0], [0, 0, 1, 0], [], []>} : vector<16x8xbf16>, vector<16x8xbf16>, vector<16x16xf32> -> vector<16x16xf32>
    %cst_28 = arith.constant dense<0xFF800000> : vector<16xf32>
    %94 = vector.multi_reduction <maximumf>, %93, %cst_28 [1] : vector<16x16xf32> to vector<16xf32>
    %95 = vector.shape_cast %94 : vector<16xf32> to vector<16x1xf32>
    %96 = vector.broadcast %95 : vector<16x1xf32> to vector<16x16xf32>
    %97 = arith.subf %93, %96 : vector<16x16xf32>
    %98 = math.exp %97 : vector<16x16xf32>
    %cst_29 = arith.constant dense<0.000000e+00> : vector<16xf32>
    %99 = vector.multi_reduction <add>, %98, %cst_29 [1] : vector<16x16xf32> to vector<16xf32>
    %100 = vector.shape_cast %99 : vector<16xf32> to vector<16x1xf32>
    %101 = tpu.reciprocal %100 {approx = true} : vector<16x1xf32> -> vector<16x1xf32>
    %102 = vector.broadcast %101 : vector<16x1xf32> to vector<16x16xf32>
    %103 = arith.mulf %98, %102 : vector<16x16xf32>
    %104 = arith.truncf %103 : vector<16x16xf32> to vector<16x16xbf16>
    %105 = arith.truncf %90 : vector<16x8xf32> to vector<16x8xbf16>
    %cst_30 = arith.constant dense<0.000000e+00> : vector<16x8xf32>
    %106 = tpu.matmul %104, %105, %cst_30 {dimension_numbers = #tpu.dot_dimension_numbers<[1], [0], [0], [1], [0, 0, 1, 1], [], []>} : vector<16x16xbf16>, vector<16x8xbf16>, vector<16x8xf32> -> vector<16x8xf32>
    %107 = vector.extract_strided_slice %2 {offsets = [24, 0], sizes = [8, 32], strides = [1, 1]} : vector<32x32xf32> to vector<8x32xf32>
    %108 = arith.truncf %106 : vector<16x8xf32> to vector<16x8xbf16>
    %109 = arith.truncf %107 : vector<8x32xf32> to vector<8x32xbf16>
    %cst_31 = arith.constant dense<0.000000e+00> : vector<16x32xf32>
    %110 = tpu.matmul %108, %109, %cst_31 {dimension_numbers = #tpu.dot_dimension_numbers<[1], [0], [0], [1], [0, 0, 1, 1], [], []>} : vector<16x8xbf16>, vector<8x32xbf16>, vector<16x32xf32> -> vector<16x32xf32>
    %111 = arith.addf %85, %110 : vector<16x32xf32>
    %c0_32 = arith.constant 0 : index
    %c0_33 = arith.constant 0 : index
    %c0_34 = arith.constant 0 : index
    %112 = vector.load %arg5[%c0_32, %c0_33, %c0_34] : memref<1x16x32xf32, #tpu.memory_space<vmem>>, vector<1x16x32xf32>
    %113 = vector.shape_cast %112 : vector<1x16x32xf32> to vector<16x32xf32>
    %114 = vector.shape_cast %111 : vector<16x32xf32> to vector<1x16x32xf32>
    tpu.vector_store %arg5[%c0_32, %c0_33, %c0_34], %114 {strides = array<i32>} : memref<1x16x32xf32, #tpu.memory_space<vmem>>, vector<1x16x32xf32>,
    return
  }
  func.func @transform_0(%arg0: i32) -> (i32, i32, i32) {
    %c0_i32 = arith.constant 0 : i32
    %c0_i32_0 = arith.constant 0 : i32
    %c0_i32_1 = arith.constant 0 : i32
    return %arg0, %c0_i32, %c0_i32_0 : i32, i32, i32
  }
  func.func @transform_1(%arg0: i32) -> (i32, i32, i32) {
    %c0_i32 = arith.constant 0 : i32
    %c0_i32_0 = arith.constant 0 : i32
    %c0_i32_1 = arith.constant 0 : i32
    return %arg0, %c0_i32, %c0_i32_0 : i32, i32, i32
  }
  func.func @transform_2(%arg0: i32) -> (i32, i32) {
    %c0_i32 = arith.constant 0 : i32
    %c0_i32_0 = arith.constant 0 : i32
    %c0_i32_1 = arith.constant 0 : i32
    return %c0_i32, %c0_i32_0 : i32, i32
  }
  func.func @transform_3(%arg0: i32) -> (i32, i32) {
    %c0_i32 = arith.constant 0 : i32
    %c0_i32_0 = arith.constant 0 : i32
    %c0_i32_1 = arith.constant 0 : i32
    return %c0_i32, %c0_i32_0 : i32, i32
  }
  func.func @transform_4(%arg0: i32) -> (i32, i32, i32) {
    %c0_i32 = arith.constant 0 : i32
    %c0_i32_0 = arith.constant 0 : i32
    %c0_i32_1 = arith.constant 0 : i32
    return %arg0, %c0_i32, %c0_i32_0 : i32, i32, i32
  }
}

module attributes {stable_mosaic.version = 11 : i64} {
  func.func @_ln_matmul_kernel(%arg0: i32, %arg1: memref<32x32xf32, #tpu.memory_space<vmem>>, %arg2: memref<1x32xf32, #tpu.memory_space<vmem>>, %arg3: memref<1x32xf32, #tpu.memory_space<vmem>>, %arg4: memref<32x96xf32, #tpu.memory_space<vmem>>, %arg5: memref<1x96xf32, #tpu.memory_space<vmem>>, %arg6: memref<32x96xf32, #tpu.memory_space<vmem>>) attributes {dimension_semantics = [#tpu.dimension_semantics<parallel>], iteration_bounds = array<i64: 1>, scalar_prefetch = 0 : i64, scratch_operands = 0 : i64, tpu.core_type = #tpu.core_type<tc>, window_params = [{transform_indices = @transform_0, window_bounds = array<i64: 32, 32>}, {pipeline_mode = #tpu.pipeline_mode<synchronous>, transform_indices = @transform_1, window_bounds = array<i64: 1, 32>}, {pipeline_mode = #tpu.pipeline_mode<synchronous>, transform_indices = @transform_2, window_bounds = array<i64: 1, 32>}, {pipeline_mode = #tpu.pipeline_mode<synchronous>, transform_indices = @transform_3, window_bounds = array<i64: 32, 96>}, {pipeline_mode = #tpu.pipeline_mode<synchronous>, transform_indices = @transform_4, window_bounds = array<i64: 1, 96>}, {transform_indices = @transform_5, window_bounds = array<i64: 32, 96>}]} {
    %c0 = arith.constant 0 : index
    %c0_0 = arith.constant 0 : index
    %0 = vector.load %arg1[%c0, %c0_0] : memref<32x32xf32, #tpu.memory_space<vmem>>, vector<32x32xf32>
    %cst = arith.constant dense<0.000000e+00> : vector<32xf32>
    %1 = vector.multi_reduction <add>, %0, %cst [1] : vector<32x32xf32> to vector<32xf32>
    %2 = vector.shape_cast %1 : vector<32xf32> to vector<32x1xf32>
    %cst_1 = arith.constant 3.200000e+01 : f32
    %3 = vector.broadcast %cst_1 : f32 to vector<32x1xf32>
    %4 = arith.divf %2, %3 : vector<32x1xf32>
    %5 = vector.broadcast %4 : vector<32x1xf32> to vector<32x32xf32>
    %6 = arith.subf %0, %5 : vector<32x32xf32>
    %7 = arith.mulf %6, %6 : vector<32x32xf32>
    %cst_2 = arith.constant dense<0.000000e+00> : vector<32xf32>
    %8 = vector.multi_reduction <add>, %7, %cst_2 [1] : vector<32x32xf32> to vector<32xf32>
    %9 = vector.shape_cast %8 : vector<32xf32> to vector<32x1xf32>
    %cst_3 = arith.constant 3.200000e+01 : f32
    %10 = vector.broadcast %cst_3 : f32 to vector<32x1xf32>
    %11 = arith.divf %9, %10 : vector<32x1xf32>
    %cst_4 = arith.constant 9.99999974E-6 : f32
    %12 = vector.broadcast %cst_4 : f32 to vector<32x1xf32>
    %13 = arith.addf %11, %12 : vector<32x1xf32>
    %14 = math.rsqrt %13 : vector<32x1xf32>
    %15 = vector.broadcast %14 : vector<32x1xf32> to vector<32x32xf32>
    %16 = arith.mulf %6, %15 : vector<32x32xf32>
    %c0_5 = arith.constant 0 : index
    %c0_6 = arith.constant 0 : index
    %17 = vector.load %arg2[%c0_5, %c0_6] : memref<1x32xf32, #tpu.memory_space<vmem>>, vector<1x32xf32>
    %18 = vector.broadcast %17 : vector<1x32xf32> to vector<32x32xf32>
    %19 = arith.mulf %16, %18 : vector<32x32xf32>
    %c0_7 = arith.constant 0 : index
    %c0_8 = arith.constant 0 : index
    %20 = vector.load %arg3[%c0_7, %c0_8] : memref<1x32xf32, #tpu.memory_space<vmem>>, vector<1x32xf32>
    %21 = vector.broadcast %20 : vector<1x32xf32> to vector<32x32xf32>
    %22 = arith.addf %19, %21 : vector<32x32xf32>
    %c0_9 = arith.constant 0 : index
    %c0_10 = arith.constant 0 : index
    %23 = vector.load %arg4[%c0_9, %c0_10] : memref<32x96xf32, #tpu.memory_space<vmem>>, vector<32x96xf32>
    %24 = arith.truncf %22 : vector<32x32xf32> to vector<32x32xbf16>
    %25 = arith.truncf %23 : vector<32x96xf32> to vector<32x96xbf16>
    %cst_11 = arith.constant dense<0.000000e+00> : vector<32x96xf32>
    %26 = tpu.matmul %24, %25, %cst_11 {dimension_numbers = #tpu.dot_dimension_numbers<[1], [0], [0], [1], [0, 0, 1, 1], [], []>} : vector<32x32xbf16>, vector<32x96xbf16>, vector<32x96xf32> -> vector<32x96xf32>
    %c0_12 = arith.constant 0 : index
    %c0_13 = arith.constant 0 : index
    %27 = vector.load %arg5[%c0_12, %c0_13] : memref<1x96xf32, #tpu.memory_space<vmem>>, vector<1x96xf32>
    %28 = vector.broadcast %27 : vector<1x96xf32> to vector<32x96xf32>
    %29 = arith.addf %26, %28 : vector<32x96xf32>
    %c0_14 = arith.constant 0 : index
    %c0_15 = arith.constant 0 : index
    %30 = vector.load %arg6[%c0_14, %c0_15] : memref<32x96xf32, #tpu.memory_space<vmem>>, vector<32x96xf32>
    tpu.vector_store %arg6[%c0_14, %c0_15], %29 {strides = array<i32>} : memref<32x96xf32, #tpu.memory_space<vmem>>, vector<32x96xf32>,
    return
  }
  func.func @transform_0(%arg0: i32) -> (i32, i32) {
    %c0_i32 = arith.constant 0 : i32
    %c0_i32_0 = arith.constant 0 : i32
    return %arg0, %c0_i32 : i32, i32
  }
  func.func @transform_1(%arg0: i32) -> (i32, i32) {
    %c0_i32 = arith.constant 0 : i32
    %c0_i32_0 = arith.constant 0 : i32
    %c0_i32_1 = arith.constant 0 : i32
    return %c0_i32, %c0_i32_0 : i32, i32
  }
  func.func @transform_2(%arg0: i32) -> (i32, i32) {
    %c0_i32 = arith.constant 0 : i32
    %c0_i32_0 = arith.constant 0 : i32
    %c0_i32_1 = arith.constant 0 : i32
    return %c0_i32, %c0_i32_0 : i32, i32
  }
  func.func @transform_3(%arg0: i32) -> (i32, i32) {
    %c0_i32 = arith.constant 0 : i32
    %c0_i32_0 = arith.constant 0 : i32
    %c0_i32_1 = arith.constant 0 : i32
    return %c0_i32, %c0_i32_0 : i32, i32
  }
  func.func @transform_4(%arg0: i32) -> (i32, i32) {
    %c0_i32 = arith.constant 0 : i32
    %c0_i32_0 = arith.constant 0 : i32
    %c0_i32_1 = arith.constant 0 : i32
    return %c0_i32, %c0_i32_0 : i32, i32
  }
  func.func @transform_5(%arg0: i32) -> (i32, i32) {
    %c0_i32 = arith.constant 0 : i32
    %c0_i32_0 = arith.constant 0 : i32
    return %arg0, %c0_i32 : i32, i32
  }
}

module attributes {stable_mosaic.version = 11 : i64} {
  func.func @_matmul_bias_add_kernel(%arg0: i32, %arg1: memref<32x64xf32, #tpu.memory_space<vmem>>, %arg2: memref<64x32xf32, #tpu.memory_space<vmem>>, %arg3: memref<1x32xf32, #tpu.memory_space<vmem>>, %arg4: memref<32x32xf32, #tpu.memory_space<vmem>>, %arg5: memref<32x32xf32, #tpu.memory_space<vmem>>) attributes {dimension_semantics = [#tpu.dimension_semantics<parallel>], iteration_bounds = array<i64: 1>, scalar_prefetch = 0 : i64, scratch_operands = 0 : i64, tpu.core_type = #tpu.core_type<tc>, window_params = [{transform_indices = @transform_0, window_bounds = array<i64: 32, 64>}, {pipeline_mode = #tpu.pipeline_mode<synchronous>, transform_indices = @transform_1, window_bounds = array<i64: 64, 32>}, {pipeline_mode = #tpu.pipeline_mode<synchronous>, transform_indices = @transform_2, window_bounds = array<i64: 1, 32>}, {transform_indices = @transform_3, window_bounds = array<i64: 32, 32>}, {transform_indices = @transform_4, window_bounds = array<i64: 32, 32>}]} {
    %c0 = arith.constant 0 : index
    %c0_0 = arith.constant 0 : index
    %0 = vector.load %arg1[%c0, %c0_0] : memref<32x64xf32, #tpu.memory_space<vmem>>, vector<32x64xf32>
    %c0_1 = arith.constant 0 : index
    %c0_2 = arith.constant 0 : index
    %1 = vector.load %arg2[%c0_1, %c0_2] : memref<64x32xf32, #tpu.memory_space<vmem>>, vector<64x32xf32>
    %2 = arith.truncf %0 : vector<32x64xf32> to vector<32x64xbf16>
    %3 = arith.truncf %1 : vector<64x32xf32> to vector<64x32xbf16>
    %cst = arith.constant dense<0.000000e+00> : vector<32x32xf32>
    %4 = tpu.matmul %2, %3, %cst {dimension_numbers = #tpu.dot_dimension_numbers<[1], [0], [0], [1], [0, 0, 1, 1], [], []>} : vector<32x64xbf16>, vector<64x32xbf16>, vector<32x32xf32> -> vector<32x32xf32>
    %c0_3 = arith.constant 0 : index
    %c0_4 = arith.constant 0 : index
    %5 = vector.load %arg3[%c0_3, %c0_4] : memref<1x32xf32, #tpu.memory_space<vmem>>, vector<1x32xf32>
    %6 = vector.broadcast %5 : vector<1x32xf32> to vector<32x32xf32>
    %7 = arith.addf %4, %6 : vector<32x32xf32>
    %c0_5 = arith.constant 0 : index
    %c0_6 = arith.constant 0 : index
    %8 = vector.load %arg4[%c0_5, %c0_6] : memref<32x32xf32, #tpu.memory_space<vmem>>, vector<32x32xf32>
    %9 = arith.addf %7, %8 : vector<32x32xf32>
    %c0_7 = arith.constant 0 : index
    %c0_8 = arith.constant 0 : index
    %10 = vector.load %arg5[%c0_7, %c0_8] : memref<32x32xf32, #tpu.memory_space<vmem>>, vector<32x32xf32>
    tpu.vector_store %arg5[%c0_7, %c0_8], %9 {strides = array<i32>} : memref<32x32xf32, #tpu.memory_space<vmem>>, vector<32x32xf32>,
    return
  }
  func.func @transform_0(%arg0: i32) -> (i32, i32) {
    %c0_i32 = arith.constant 0 : i32
    %c0_i32_0 = arith.constant 0 : i32
    return %arg0, %c0_i32 : i32, i32
  }
  func.func @transform_1(%arg0: i32) -> (i32, i32) {
    %c0_i32 = arith.constant 0 : i32
    %c0_i32_0 = arith.constant 0 : i32
    %c0_i32_1 = arith.constant 0 : i32
    return %c0_i32, %c0_i32_0 : i32, i32
  }
  func.func @transform_2(%arg0: i32) -> (i32, i32) {
    %c0_i32 = arith.constant 0 : i32
    %c0_i32_0 = arith.constant 0 : i32
    %c0_i32_1 = arith.constant 0 : i32
    return %c0_i32, %c0_i32_0 : i32, i32
  }
  func.func @transform_3(%arg0: i32) -> (i32, i32) {
    %c0_i32 = arith.constant 0 : i32
    %c0_i32_0 = arith.constant 0 : i32
    return %arg0, %c0_i32 : i32, i32
  }
  func.func @transform_4(%arg0: i32) -> (i32, i32) {
    %c0_i32 = arith.constant 0 : i32
    %c0_i32_0 = arith.constant 0 : i32
    return %arg0, %c0_i32 : i32, i32
  }
}

module attributes {stable_mosaic.version = 11 : i64} {
  func.func @_ln_matmul_kernel(%arg0: i32, %arg1: memref<32x32xf32, #tpu.memory_space<vmem>>, %arg2: memref<1x32xf32, #tpu.memory_space<vmem>>, %arg3: memref<1x32xf32, #tpu.memory_space<vmem>>, %arg4: memref<32x64xf32, #tpu.memory_space<vmem>>, %arg5: memref<1x64xf32, #tpu.memory_space<vmem>>, %arg6: memref<32x64xf32, #tpu.memory_space<vmem>>) attributes {dimension_semantics = [#tpu.dimension_semantics<parallel>], iteration_bounds = array<i64: 1>, scalar_prefetch = 0 : i64, scratch_operands = 0 : i64, tpu.core_type = #tpu.core_type<tc>, window_params = [{transform_indices = @transform_0, window_bounds = array<i64: 32, 32>}, {pipeline_mode = #tpu.pipeline_mode<synchronous>, transform_indices = @transform_1, window_bounds = array<i64: 1, 32>}, {pipeline_mode = #tpu.pipeline_mode<synchronous>, transform_indices = @transform_2, window_bounds = array<i64: 1, 32>}, {pipeline_mode = #tpu.pipeline_mode<synchronous>, transform_indices = @transform_3, window_bounds = array<i64: 32, 64>}, {pipeline_mode = #tpu.pipeline_mode<synchronous>, transform_indices = @transform_4, window_bounds = array<i64: 1, 64>}, {transform_indices = @transform_5, window_bounds = array<i64: 32, 64>}]} {
    %c0 = arith.constant 0 : index
    %c0_0 = arith.constant 0 : index
    %0 = vector.load %arg1[%c0, %c0_0] : memref<32x32xf32, #tpu.memory_space<vmem>>, vector<32x32xf32>
    %cst = arith.constant dense<0.000000e+00> : vector<32xf32>
    %1 = vector.multi_reduction <add>, %0, %cst [1] : vector<32x32xf32> to vector<32xf32>
    %2 = vector.shape_cast %1 : vector<32xf32> to vector<32x1xf32>
    %cst_1 = arith.constant 3.200000e+01 : f32
    %3 = vector.broadcast %cst_1 : f32 to vector<32x1xf32>
    %4 = arith.divf %2, %3 : vector<32x1xf32>
    %5 = vector.broadcast %4 : vector<32x1xf32> to vector<32x32xf32>
    %6 = arith.subf %0, %5 : vector<32x32xf32>
    %7 = arith.mulf %6, %6 : vector<32x32xf32>
    %cst_2 = arith.constant dense<0.000000e+00> : vector<32xf32>
    %8 = vector.multi_reduction <add>, %7, %cst_2 [1] : vector<32x32xf32> to vector<32xf32>
    %9 = vector.shape_cast %8 : vector<32xf32> to vector<32x1xf32>
    %cst_3 = arith.constant 3.200000e+01 : f32
    %10 = vector.broadcast %cst_3 : f32 to vector<32x1xf32>
    %11 = arith.divf %9, %10 : vector<32x1xf32>
    %cst_4 = arith.constant 9.99999974E-6 : f32
    %12 = vector.broadcast %cst_4 : f32 to vector<32x1xf32>
    %13 = arith.addf %11, %12 : vector<32x1xf32>
    %14 = math.rsqrt %13 : vector<32x1xf32>
    %15 = vector.broadcast %14 : vector<32x1xf32> to vector<32x32xf32>
    %16 = arith.mulf %6, %15 : vector<32x32xf32>
    %c0_5 = arith.constant 0 : index
    %c0_6 = arith.constant 0 : index
    %17 = vector.load %arg2[%c0_5, %c0_6] : memref<1x32xf32, #tpu.memory_space<vmem>>, vector<1x32xf32>
    %18 = vector.broadcast %17 : vector<1x32xf32> to vector<32x32xf32>
    %19 = arith.mulf %16, %18 : vector<32x32xf32>
    %c0_7 = arith.constant 0 : index
    %c0_8 = arith.constant 0 : index
    %20 = vector.load %arg3[%c0_7, %c0_8] : memref<1x32xf32, #tpu.memory_space<vmem>>, vector<1x32xf32>
    %21 = vector.broadcast %20 : vector<1x32xf32> to vector<32x32xf32>
    %22 = arith.addf %19, %21 : vector<32x32xf32>
    %c0_9 = arith.constant 0 : index
    %c0_10 = arith.constant 0 : index
    %23 = vector.load %arg4[%c0_9, %c0_10] : memref<32x64xf32, #tpu.memory_space<vmem>>, vector<32x64xf32>
    %24 = arith.truncf %22 : vector<32x32xf32> to vector<32x32xbf16>
    %25 = arith.truncf %23 : vector<32x64xf32> to vector<32x64xbf16>
    %cst_11 = arith.constant dense<0.000000e+00> : vector<32x64xf32>
    %26 = tpu.matmul %24, %25, %cst_11 {dimension_numbers = #tpu.dot_dimension_numbers<[1], [0], [0], [1], [0, 0, 1, 1], [], []>} : vector<32x32xbf16>, vector<32x64xbf16>, vector<32x64xf32> -> vector<32x64xf32>
    %c0_12 = arith.constant 0 : index
    %c0_13 = arith.constant 0 : index
    %27 = vector.load %arg5[%c0_12, %c0_13] : memref<1x64xf32, #tpu.memory_space<vmem>>, vector<1x64xf32>
    %28 = vector.broadcast %27 : vector<1x64xf32> to vector<32x64xf32>
    %29 = arith.addf %26, %28 : vector<32x64xf32>
    %cst_14 = arith.constant 5.000000e-01 : f32
    %30 = vector.broadcast %cst_14 : f32 to vector<32x64xf32>
    %31 = arith.mulf %30, %29 : vector<32x64xf32>
    %cst_15 = arith.constant 4.471500e-02 : f32
    %32 = vector.broadcast %cst_15 : f32 to vector<32x64xf32>
    %33 = arith.mulf %32, %29 : vector<32x64xf32>
    %34 = arith.mulf %33, %29 : vector<32x64xf32>
    %35 = arith.mulf %34, %29 : vector<32x64xf32>
    %36 = arith.addf %29, %35 : vector<32x64xf32>
    %cst_16 = arith.constant 0.797884583 : f32
    %37 = vector.broadcast %cst_16 : f32 to vector<32x64xf32>
    %38 = arith.mulf %37, %36 : vector<32x64xf32>
    %39 = math.tanh %38 : vector<32x64xf32>
    %cst_17 = arith.constant 1.000000e+00 : f32
    %40 = vector.broadcast %cst_17 : f32 to vector<32x64xf32>
    %41 = arith.addf %40, %39 : vector<32x64xf32>
    %42 = arith.mulf %31, %41 : vector<32x64xf32>
    %c0_18 = arith.constant 0 : index
    %c0_19 = arith.constant 0 : index
    %43 = vector.load %arg6[%c0_18, %c0_19] : memref<32x64xf32, #tpu.memory_space<vmem>>, vector<32x64xf32>
    tpu.vector_store %arg6[%c0_18, %c0_19], %42 {strides = array<i32>} : memref<32x64xf32, #tpu.memory_space<vmem>>, vector<32x64xf32>,
    return
  }
  func.func @transform_0(%arg0: i32) -> (i32, i32) {
    %c0_i32 = arith.constant 0 : i32
    %c0_i32_0 = arith.constant 0 : i32
    return %arg0, %c0_i32 : i32, i32
  }
  func.func @transform_1(%arg0: i32) -> (i32, i32) {
    %c0_i32 = arith.constant 0 : i32
    %c0_i32_0 = arith.constant 0 : i32
    %c0_i32_1 = arith.constant 0 : i32
    return %c0_i32, %c0_i32_0 : i32, i32
  }
  func.func @transform_2(%arg0: i32) -> (i32, i32) {
    %c0_i32 = arith.constant 0 : i32
    %c0_i32_0 = arith.constant 0 : i32
    %c0_i32_1 = arith.constant 0 : i32
    return %c0_i32, %c0_i32_0 : i32, i32
  }
  func.func @transform_3(%arg0: i32) -> (i32, i32) {
    %c0_i32 = arith.constant 0 : i32
    %c0_i32_0 = arith.constant 0 : i32
    %c0_i32_1 = arith.constant 0 : i32
    return %c0_i32, %c0_i32_0 : i32, i32
  }
  func.func @transform_4(%arg0: i32) -> (i32, i32) {
    %c0_i32 = arith.constant 0 : i32
    %c0_i32_0 = arith.constant 0 : i32
    %c0_i32_1 = arith.constant 0 : i32
    return %c0_i32, %c0_i32_0 : i32, i32
  }
  func.func @transform_5(%arg0: i32) -> (i32, i32) {
    %c0_i32 = arith.constant 0 : i32
    %c0_i32_0 = arith.constant 0 : i32
    return %arg0, %c0_i32 : i32, i32
  }
}

module attributes {stable_mosaic.version = 11 : i64} {
  func.func @_ln_matmul_kernel(%arg0: i32, %arg1: memref<32x32xf32, #tpu.memory_space<vmem>>, %arg2: memref<1x32xf32, #tpu.memory_space<vmem>>, %arg3: memref<1x32xf32, #tpu.memory_space<vmem>>, %arg4: memref<32x64xf32, #tpu.memory_space<vmem>>, %arg5: memref<1x64xf32, #tpu.memory_space<vmem>>, %arg6: memref<32x64xf32, #tpu.memory_space<vmem>>) attributes {dimension_semantics = [#tpu.dimension_semantics<parallel>], iteration_bounds = array<i64: 1>, scalar_prefetch = 0 : i64, scratch_operands = 0 : i64, tpu.core_type = #tpu.core_type<tc>, window_params = [{transform_indices = @transform_0, window_bounds = array<i64: 32, 32>}, {pipeline_mode = #tpu.pipeline_mode<synchronous>, transform_indices = @transform_1, window_bounds = array<i64: 1, 32>}, {pipeline_mode = #tpu.pipeline_mode<synchronous>, transform_indices = @transform_2, window_bounds = array<i64: 1, 32>}, {pipeline_mode = #tpu.pipeline_mode<synchronous>, transform_indices = @transform_3, window_bounds = array<i64: 32, 64>}, {pipeline_mode = #tpu.pipeline_mode<synchronous>, transform_indices = @transform_4, window_bounds = array<i64: 1, 64>}, {transform_indices = @transform_5, window_bounds = array<i64: 32, 64>}]} {
    %c0 = arith.constant 0 : index
    %c0_0 = arith.constant 0 : index
    %0 = vector.load %arg1[%c0, %c0_0] : memref<32x32xf32, #tpu.memory_space<vmem>>, vector<32x32xf32>
    %cst = arith.constant dense<0.000000e+00> : vector<32xf32>
    %1 = vector.multi_reduction <add>, %0, %cst [1] : vector<32x32xf32> to vector<32xf32>
    %2 = vector.shape_cast %1 : vector<32xf32> to vector<32x1xf32>
    %cst_1 = arith.constant 3.200000e+01 : f32
    %3 = vector.broadcast %cst_1 : f32 to vector<32x1xf32>
    %4 = arith.divf %2, %3 : vector<32x1xf32>
    %5 = vector.broadcast %4 : vector<32x1xf32> to vector<32x32xf32>
    %6 = arith.subf %0, %5 : vector<32x32xf32>
    %7 = arith.mulf %6, %6 : vector<32x32xf32>
    %cst_2 = arith.constant dense<0.000000e+00> : vector<32xf32>
    %8 = vector.multi_reduction <add>, %7, %cst_2 [1] : vector<32x32xf32> to vector<32xf32>
    %9 = vector.shape_cast %8 : vector<32xf32> to vector<32x1xf32>
    %cst_3 = arith.constant 3.200000e+01 : f32
    %10 = vector.broadcast %cst_3 : f32 to vector<32x1xf32>
    %11 = arith.divf %9, %10 : vector<32x1xf32>
    %cst_4 = arith.constant 9.99999974E-6 : f32
    %12 = vector.broadcast %cst_4 : f32 to vector<32x1xf32>
    %13 = arith.addf %11, %12 : vector<32x1xf32>
    %14 = math.rsqrt %13 : vector<32x1xf32>
    %15 = vector.broadcast %14 : vector<32x1xf32> to vector<32x32xf32>
    %16 = arith.mulf %6, %15 : vector<32x32xf32>
    %c0_5 = arith.constant 0 : index
    %c0_6 = arith.constant 0 : index
    %17 = vector.load %arg2[%c0_5, %c0_6] : memref<1x32xf32, #tpu.memory_space<vmem>>, vector<1x32xf32>
    %18 = vector.broadcast %17 : vector<1x32xf32> to vector<32x32xf32>
    %19 = arith.mulf %16, %18 : vector<32x32xf32>
    %c0_7 = arith.constant 0 : index
    %c0_8 = arith.constant 0 : index
    %20 = vector.load %arg3[%c0_7, %c0_8] : memref<1x32xf32, #tpu.memory_space<vmem>>, vector<1x32xf32>
    %21 = vector.broadcast %20 : vector<1x32xf32> to vector<32x32xf32>
    %22 = arith.addf %19, %21 : vector<32x32xf32>
    %c0_9 = arith.constant 0 : index
    %c0_10 = arith.constant 0 : index
    %23 = vector.load %arg4[%c0_9, %c0_10] : memref<32x64xf32, #tpu.memory_space<vmem>>, vector<32x64xf32>
    %24 = arith.truncf %22 : vector<32x32xf32> to vector<32x32xbf16>
    %25 = arith.truncf %23 : vector<32x64xf32> to vector<32x64xbf16>
    %cst_11 = arith.constant dense<0.000000e+00> : vector<32x64xf32>
    %26 = tpu.matmul %24, %25, %cst_11 {dimension_numbers = #tpu.dot_dimension_numbers<[1], [0], [0], [1], [0, 0, 1, 1], [], []>} : vector<32x32xbf16>, vector<32x64xbf16>, vector<32x64xf32> -> vector<32x64xf32>
    %c0_12 = arith.constant 0 : index
    %c0_13 = arith.constant 0 : index
    %27 = vector.load %arg5[%c0_12, %c0_13] : memref<1x64xf32, #tpu.memory_space<vmem>>, vector<1x64xf32>
    %28 = vector.broadcast %27 : vector<1x64xf32> to vector<32x64xf32>
    %29 = arith.addf %26, %28 : vector<32x64xf32>
    %c0_14 = arith.constant 0 : index
    %c0_15 = arith.constant 0 : index
    %30 = vector.load %arg6[%c0_14, %c0_15] : memref<32x64xf32, #tpu.memory_space<vmem>>, vector<32x64xf32>
    tpu.vector_store %arg6[%c0_14, %c0_15], %29 {strides = array<i32>} : memref<32x64xf32, #tpu.memory_space<vmem>>, vector<32x64xf32>,
    return
  }
  func.func @transform_0(%arg0: i32) -> (i32, i32) {
    %c0_i32 = arith.constant 0 : i32
    %c0_i32_0 = arith.constant 0 : i32
    return %arg0, %c0_i32 : i32, i32
  }
  func.func @transform_1(%arg0: i32) -> (i32, i32) {
    %c0_i32 = arith.constant 0 : i32
    %c0_i32_0 = arith.constant 0 : i32
    %c0_i32_1 = arith.constant 0 : i32
    return %c0_i32, %c0_i32_0 : i32, i32
  }
  func.func @transform_2(%arg0: i32) -> (i32, i32) {
    %c0_i32 = arith.constant 0 : i32
    %c0_i32_0 = arith.constant 0 : i32
    %c0_i32_1 = arith.constant 0 : i32
    return %c0_i32, %c0_i32_0 : i32, i32
  }
  func.func @transform_3(%arg0: i32) -> (i32, i32) {
    %c0_i32 = arith.constant 0 : i32
    %c0_i32_0 = arith.constant 0 : i32
    %c0_i32_1 = arith.constant 0 : i32
    return %c0_i32, %c0_i32_0 : i32, i32
  }
  func.func @transform_4(%arg0: i32) -> (i32, i32) {
    %c0_i32 = arith.constant 0 : i32
    %c0_i32_0 = arith.constant 0 : i32
    %c0_i32_1 = arith.constant 0 : i32
    return %c0_i32, %c0_i32_0 : i32, i32
  }
  func.func @transform_5(%arg0: i32) -> (i32, i32) {
    %c0_i32 = arith.constant 0 : i32
    %c0_i32_0 = arith.constant 0 : i32
    return %arg0, %c0_i32 : i32, i32
  }
}

</mosaic_0001>

<bundles_post_ra>
// kernel: tpu_custom_call.1
= control target key start
LH: loop header
LB: loop body
LE: loop exit
PB: predicated region body
PF: predicated region fallthrough
CT: control target
= control target key end

     0   :  { %6 = vsyncpa [#allocation3], 0  ;;  %s102_s0 = inlined_call_operand.hbm [shape: f32[8,128], index: 0, kind: input, shape index: {}]   ;;  %s103_s1 = inlined_call_operand.hbm [shape: f32[8,128], index: 1, kind: output, shape index: {}]  }
   0x1   :  { %7 = vsyncpa [#allocation4], 0  ;;  %s84_s6 = smov [#allocation2]  }
   0x2   :  { %s14_s7 = sshll.u32 %s84_s6, 4  ;;  %s15_s7 = int_to_ptr.vmem [resolvable:$true] %s14_s7 }
   0x3   :  { %s48_s8 = scalar_lea.vmem %s15_s7, 128  ;;  %p53_p1 = scmp.lt.s32.totalorder %s15_s7, %s15_s7 }
   0x4   :  { %p49_p0 = scmp.ne.s32.totalorder %s15_s7, %s48_s8  ;;  %p54_p2 = scmp.lt.s32.totalorder %s48_s8, %s48_s8 }
   0x6   :  { %p55_p3 = por %p54_p2, %p53_p1 }
   0x8   :  { %p56_p4 = pnand %p55_p3, %p49_p0 }
   0xa   :  { %59 = shalt.err (!%p56_p4)
}
   0xb   :  { %17 = dma.hbm_to_vmem [thread:$0]  %s102_s0, 128, %s15_s7, [#allocation3]  }
   0xc   :  { %80 = dma.done.wait [#allocation3], 128  }
   0xd   :  { %81 = vsyncadd [#allocation3], 4294967168  ;;  %s85_s11 = smov [#allocation5]   ;;  %v21_v0 = vld [vmem:[#allocation2] sm:$0xff] }
   0xe   :  { %s29_s12 = sshll.u32 %s85_s11, 4  ;;  %22 = vst [vmem:[#allocation5] sm:$0xff] %v21_v0  ;;  %s30_s12 = int_to_ptr.vmem [resolvable:$true] %s29_s12 }
   0xf   :  { %s60_s13 = scalar_lea.vmem %s30_s12, 128  ;;  %p65_p6 = scmp.lt.s32.totalorder %s30_s12, %s30_s12 }
  0x10   :  { %p61_p5 = scmp.ne.s32.totalorder %s30_s12, %s60_s13  ;;  %p66_p7 = scmp.lt.s32.totalorder %s60_s13, %s60_s13 }
  0x12   :  { %p67_p8 = por %p66_p7, %p65_p6 }
  0x14   :  { %p68_p9 = pnand %p67_p8, %p61_p5 }
  0x16   :  { %71 = shalt.err (!%p68_p9)
}
  0x17   :  { %32 = dma.vmem_to_hbm [thread:$0]  %s30_s12, 128, %s103_s1, [#allocation4]  }
  0x18   :  { %82 = dma.done.wait [#allocation4], 128  }
  0x19   :  { %83 = vsyncadd [#allocation4], 4294967168 }
  0x1a   :  { %36 = vsyncpa [#allocation3], 1 }
  0x1b   :  { %37 = vsyncpa [#allocation4], 1 }

// kernel: _lambda_.10
= control target key start
LH: loop header
LB: loop body
LE: loop exit
PB: predicated region body
PF: predicated region fallthrough
CT: control target
= control target key end

     0   :  { %vm43_vm0 = vcmask 523264   ;;  %vm107_vm1 = vcmask 261120   ;;  %s231_s1 = inlined_call_operand.vmem [shape: f32[64,32], index: 1, kind: input, shape index: {}]   ;;  %s232_s0 = inlined_call_operand.vmem [shape: f32[32,64], index: 0, kind: input, shape index: {}]   ;;  %s233_s2 = inlined_call_operand.vmem [shape: f32[1,32], index: 2, kind: input, shape index: {}]   ;;  %s234_s3 = inlined_call_operand.vmem [shape: f32[32,32], index: 3, kind: input, shape index: {}]   ;;  %s235_s4 = inlined_call_operand.vmem [shape: f32[32,32], index: 4, kind: output, shape index: {}]  }
   0x1   :  { %v28_v0 = vld [vmem:[%s231_s1 + $0x30] sm:$0xff]  ;;  %v29_v1 = vld [vmem:[%s231_s1 + $0x38] sm:$0xff]  ;;  %v26_v2 = vld [vmem:[%s231_s1 + $0x20] sm:$0xff] }
   0x2   :  { %v35_v3 = vpack.c.bf16 %v29_v1, %v28_v0  ;;  %v27_v4 = vld [vmem:[%s231_s1 + $0x28] sm:$0xff]  ;;  %v24_v6 = vld [vmem:[%s231_s1 + $0x10] sm:$0xff]  ;;  %v25_v7 = vld [vmem:[%s231_s1 + $0x18] sm:$0xff] }
   0x3   :  { %v34_v5 = vpack.c.bf16 %v27_v4, %v26_v2  ;;  %v18_v8 = vld [vmem:[%s232_s0] sm:$0xff]  ;;  %v19_v9 = vld [vmem:[%s232_s0 + $0x8] sm:$0xff]  ;;  %v33_v11 = vpack.c.bf16 %v25_v7, %v24_v6  ;;  %v20_v15 = vld [vmem:[%s232_s0 + $0x10] sm:$0xff] }
   0x4   :  { %125 = vmatprep.subr.bf16.mxu0 %v35_v3  ;;  %v30_v10 = vpack.c.bf16 %v19_v9, %v18_v8  ;;  %v22_v12 = vld [vmem:[%s231_s1] sm:$0xff]  ;;  %v23_v13 = vld [vmem:[%s231_s1 + $0x8] sm:$0xff]  ;;  %v21_v16 = vld [vmem:[%s232_s0 + $0x18] sm:$0xff] }
   0x5   :  { %126 = vmatpush3.bf16.msra.mxu0 %v35_v3  ;;  %v32_v14 = vpack.c.bf16 %v23_v13, %v22_v12  ;;  %v31_v17 = vpack.c.bf16 %v21_v16, %v20_v15  ;;  %v116_v18 = vld [vmem:[%s233_s2] ss:$0 sm:$0xff]  ;;  %v101_v20 = vld [vmem:[%s234_s3 + $0x10] sm:$0xff]  ;;  %v102_v27 = vld [vmem:[%s234_s3 + $0x18] sm:$0xff] }
   0x6   :  { %127 = vmatprep.subr.bf16.mxu0 %v34_v5  ;;  %133 = vmatprep.mubr.msk.bf16.mxu0 %vm43_vm0, %v30_v10  ;;  %v99_v23 = vld [vmem:[%s234_s3] sm:$0xff]  ;;  %v100_v31 = vld [vmem:[%s234_s3 + $0x8] sm:$0xff] }
   0x9   :  { %128 = vmatpush3.bf16.msra.mxu0 %v34_v5 }
   0xa   :  { %129 = vmatprep.subr.bf16.mxu0 %v33_v11 }
   0xd   :  { %130 = vmatpush3.bf16.msra.mxu0 %v33_v11 }
   0xe   :  { %131 = vmatprep.subr.bf16.mxu0 %v32_v14 }
  0x11   :  { %132 = vmatpush3.bf16.msra.mxu0 %v32_v14 }
  0x14   :  { %134 = vmatmul.mubr.msk.bf16.vlgmr.msra.gmra.mxu0 %vm43_vm0, %v31_v17 }
  0xd4   :  { %v135_v19 = vpop.f32.mrf.mxu0 }
  0xd5   :  { %v93_v21 = vadd.f32 %v135_v19, %v116_v18 }
  0xd6   :  { %v84_v22 = vpop.f32.mrf.mxu0 }
  0xd7   :  { %v105_v24 = vadd.f32 %v101_v20, %v93_v21  ;;  %v85_v25 = vadd.f32 %v116_v18, %v84_v22 }
  0xd8   :  { %v136_v26 = vpop.f32.mrf.mxu0 }
  0xd9   :  { %110 = vst.msk [vmem:[%s235_s4 + $0x10] sm:$0xff] %vm107_vm1, %v105_v24  ;;  %v103_v28 = vadd.f32 %v99_v23, %v85_v25  ;;  %v96_v29 = vadd.f32 %v136_v26, %v116_v18 }
  0xda   :  { %v87_v30 = vpop.f32.mrf.mxu0 }
  0xdb   :  { %108 = vst.msk [vmem:[%s235_s4] sm:$0xff] %vm107_vm1, %v103_v28  ;;  %v106_v32 = vadd.f32 %v102_v27, %v96_v29  ;;  %v88_v33 = vadd.f32 %v116_v18, %v87_v30 }
  0xdd   :  { %111 = vst.msk [vmem:[%s235_s4 + $0x18] sm:$0xff] %vm107_vm1, %v106_v32  ;;  %v104_v34 = vadd.f32 %v100_v31, %v88_v33 }
  0xdf   :  { %109 = vst.msk [vmem:[%s235_s4 + $0x8] sm:$0xff] %vm107_vm1, %v104_v34 }

// kernel: _lambda_.11
= control target key start
LH: loop header
LB: loop body
LE: loop exit
PB: predicated region body
PF: predicated region fallthrough
CT: control target
= control target key end

     0   :  { %vm25_vm0 = vcmask 261120   ;;  %vm171_vm1 = vcmask 785408   ;;  %s290_s0 = inlined_call_operand.vmem [shape: f32[32,32], index: 0, kind: input, shape index: {}]   ;;  %s291_s3 = inlined_call_operand.vmem [shape: f32[32,96], index: 3, kind: input, shape index: {}]   ;;  %s292_s1 = inlined_call_operand.vmem [shape: f32[1,32], index: 1, kind: input, shape index: {}]   ;;  %s293_s2 = inlined_call_operand.vmem [shape: f32[1,32], index: 2, kind: input, shape index: {}]   ;;  %s294_s4 = inlined_call_operand.vmem [shape: f32[1,96], index: 4, kind: input, shape index: {}]   ;;  %s295_s5 = inlined_call_operand.vmem [shape: f32[32,96], index: 5, kind: output, shape index: {}]  }
   0x1   :  { %v21_v0 = vld [vmem:[%s290_s0] sm:$0xff]  ;;  %v23_v1 = vld [vmem:[%s290_s0 + $0x10] sm:$0xff]  ;;  %v22_v2 = vld [vmem:[%s290_s0 + $0x8] sm:$0xff] }
   0x2   :  { %v26_v3 = vsel %vm25_vm0, %v21_v0, 0.0  ;;  %v32_v4 = vsel %vm25_vm0, %v23_v1, 0.0  ;;  %v24_v5 = vld [vmem:[%s290_s0 + $0x18] sm:$0xff]  ;;  %v29_v6 = vsel %vm25_vm0, %v22_v2, 0.0  ;;  %v103_v28 = vld [vmem:[%s291_s3 + $0x10] sm:$0xff]  ;;  %v101_v30 = vld [vmem:[%s291_s3] sm:$0xff] }
   0x3   :  { %27 = vadd.xlane.f32.xlu0 %v26_v3  ;;  %33 = vadd.xlane.f32.xlu1 %v32_v4  ;;  %v35_v7 = vsel %vm25_vm0, %v24_v5, 0.0  ;;  %v104_v29 = vld [vmem:[%s291_s3 + $0x18] sm:$0xff]  ;;  %v102_v32 = vld [vmem:[%s291_s3 + $0x8] sm:$0xff]  ;;  %v180_v48 = vld [vmem:[%s292_s1] ss:$0 sm:$0xff] }
   0x4   :  { %v108_v31 = vpack.c.bf16 %v104_v29, %v103_v28  ;;  %v107_v33 = vpack.c.bf16 %v102_v32, %v101_v30  ;;  %v181_v53 = vld [vmem:[%s293_s2] ss:$0 sm:$0xff] }
   0x6   :  { %189 = vmatprep.subr.bf16.mxu0 %v108_v31 }
   0x7   :  { %30 = vadd.xlane.f32.xlu0 %v29_v6  ;;  %36 = vadd.xlane.f32.xlu1 %v35_v7 }
   0x8   :  { %190 = vmatpush3.bf16.msra.mxu0 %v108_v31 }
   0x9   :  { %191 = vmatprep.subr.bf16.mxu0 %v107_v33 }
   0xc   :  { %192 = vmatpush3.bf16.msra.mxu0 %v107_v33 }
  0x8c   :  { %v28_v8 = vpop.xlane.xlu0 %27  ;;  %v34_v9 = vpop.xlane.xlu1 %33 }
  0x8d   :  { %v39_v10 = vmul.f32 0.03125, %v28_v8  ;;  %v41_v11 = vmul.f32 0.03125, %v34_v9 }
  0x8f   :  { %v43_v12 = vsub.f32 %v21_v0, %v39_v10  ;;  %v45_v13 = vsub.f32 %v23_v1, %v41_v11 }
  0x90   :  { %v31_v14 = vpop.xlane.xlu0 %30  ;;  %v37_v15 = vpop.xlane.xlu1 %36 }
  0x91   :  { %v40_v16 = vmul.f32 0.03125, %v31_v14  ;;  %v42_v17 = vmul.f32 0.03125, %v37_v15  ;;  %v47_v18 = vmul.f32 %v43_v12, %v43_v12  ;;  %v49_v19 = vmul.f32 %v45_v13, %v45_v13 }
  0x93   :  { %v44_v20 = vsub.f32 %v22_v2, %v40_v16  ;;  %v46_v21 = vsub.f32 %v24_v5, %v42_v17  ;;  %v51_v22 = vsel %vm25_vm0, %v47_v18, 0.0  ;;  %v57_v23 = vsel %vm25_vm0, %v49_v19, 0.0  ;;  %v182_v2 = vld [vmem:[%s294_s4] ss:$0 sm:$0xff] }
  0x94   :  { %52 = vadd.xlane.f32.xlu0 %v51_v22 }
  0x95   :  { %v48_v24 = vmul.f32 %v44_v20, %v44_v20  ;;  %v50_v25 = vmul.f32 %v46_v21, %v46_v21 }
  0x97   :  { %v54_v26 = vsel %vm25_vm0, %v48_v24, 0.0  ;;  %v60_v27 = vsel %vm25_vm0, %v50_v25, 0.0 }
  0x98   :  { %58 = vadd.xlane.f32.xlu0 %v57_v23  ;;  %55 = vadd.xlane.f32.xlu1 %v54_v26 }
  0x9c   :  { %61 = vadd.xlane.f32.xlu1 %v60_v27 }
 0x11d   :  { %v53_v34 = vpop.xlane.xlu0 %52 }
 0x11e   :  { %v63_v35 = vmul.f32 0.03125, %v53_v34 }
 0x120   :  { %v67_v36 = vadd.f32 1e-05, %v63_v35 }
 0x121   :  { %v56_v37 = vpop.xlane.xlu1 %55  ;;  %v59_v38 = vpop.xlane.xlu0 %58 }
 0x122   :  { %197 = vrsqrt.f32 %v67_v36  ;;  %v64_v39 = vmul.f32 0.03125, %v56_v37  ;;  %v65_v40 = vmul.f32 0.03125, %v59_v38 }
 0x124   :  { %v68_v41 = vadd.f32 1e-05, %v64_v39  ;;  %v69_v42 = vadd.f32 1e-05, %v65_v40 }
 0x125   :  { %v62_v43 = vpop.xlane.xlu1 %61 }
 0x126   :  { %199 = vrsqrt.f32 %v68_v41  ;;  %v66_v44 = vmul.f32 0.03125, %v62_v43 }
 0x127   :  { %201 = vrsqrt.f32 %v69_v42 }
 0x128   :  { %v70_v45 = vadd.f32 1e-05, %v66_v44 }
 0x12a   :  { %203 = vrsqrt.f32 %v70_v45 }
 0x12f   :  { %v198_v46 = vpop.eup %197 }
 0x130   :  { %v75_v47 = vmul.f32 %v198_v46, %v43_v12 }
 0x132   :  { %v86_v52 = vmul.f32 %v180_v48, %v75_v47 }
 0x133   :  { %v200_v49 = vpop.eup %199 }
 0x134   :  { %v202_v50 = vpop.eup %201  ;;  %v76_v51 = vmul.f32 %v200_v49, %v44_v20  ;;  %v97_v57 = vadd.f32 %v181_v53, %v86_v52 }
 0x135   :  { %v77_v54 = vmul.f32 %v202_v50, %v45_v13 }
 0x136   :  { %v87_v55 = vmul.f32 %v180_v48, %v76_v51 }
 0x137   :  { %v204_v56 = vpop.eup %203  ;;  %v88_v60 = vmul.f32 %v180_v48, %v77_v54 }
 0x138   :  { %v98_v58 = vadd.f32 %v181_v53, %v87_v55  ;;  %v78_v59 = vmul.f32 %v204_v56, %v46_v21 }
 0x139   :  { %v99_v63 = vadd.f32 %v181_v53, %v88_v60 }
 0x13a   :  { %v105_v61 = vpack.c.bf16 %v98_v58, %v97_v57  ;;  %v89_v62 = vmul.f32 %v180_v48, %v78_v59 }
 0x13c   :  { %193 = vmatprep.mubr.msk.bf16.mxu0 %vm25_vm0, %v105_v61  ;;  %v100_v0 = vadd.f32 %v181_v53, %v89_v62 }
 0x13e   :  { %v106_v1 = vpack.c.bf16 %v100_v0, %v99_v63 }
 0x140   :  { %194 = vmatmul.mubr.msk.bf16.vlgmr.msra.gmra.mxu0 %vm25_vm0, %v106_v1 }
 0x200   :  { %v195_v3 = vpop.f32.mrf.mxu0 }
 0x201   :  { %v165_v4 = vadd.f32 %v195_v3, %v182_v2 }
 0x202   :  { %v156_v5 = vpop.f32.mrf.mxu0 }
 0x203   :  { %174 = vst.msk [vmem:[%s295_s5 + $0x10] sm:$0xff] %vm171_vm1, %v165_v4  ;;  %v157_v6 = vadd.f32 %v182_v2, %v156_v5 }
 0x204   :  { %v196_v7 = vpop.f32.mrf.mxu0 }
 0x205   :  { %172 = vst.msk [vmem:[%s295_s5] sm:$0xff] %vm171_vm1, %v157_v6  ;;  %v168_v8 = vadd.f32 %v196_v7, %v182_v2 }
 0x206   :  { %v159_v9 = vpop.f32.mrf.mxu0 }
 0x207   :  { %175 = vst.msk [vmem:[%s295_s5 + $0x18] sm:$0xff] %vm171_vm1, %v168_v8  ;;  %v160_v10 = vadd.f32 %v182_v2, %v159_v9 }
 0x209   :  { %173 = vst.msk [vmem:[%s295_s5 + $0x8] sm:$0xff] %vm171_vm1, %v160_v10 }

// kernel: _lambda_.12
= control target key start
LH: loop header
LB: loop body
LE: loop exit
PB: predicated region body
PF: predicated region fallthrough
CT: control target
= control target key end

     0   :  { %s1225_s15 = smov 0   ;;  %s1359_s0 = inlined_call_operand.vmem [shape: f32[2,16,96], index: 0, kind: input, shape index: {}]   ;;  %s1360_s1 = inlined_call_operand.vmem [shape: f32[2,16,32], index: 1, kind: input, shape index: {}]   ;;  %s1361_s2 = inlined_call_operand.vmem [shape: f32[32,32], index: 2, kind: input, shape index: {}]   ;;  %s1362_s3 = inlined_call_operand.vmem [shape: f32[1,32], index: 3, kind: input, shape index: {}]   ;;  %s1363_s4 = inlined_call_operand.vmem [shape: f32[2,16,32], index: 4, kind: output, shape index: {}]  }
   0x1 LB: > { %s1001_s16 = sadd.s32 4294967295, %s1185_s15   ;;  %p1005_p0 = scmp.ge.s32.totalorder %s1185_s15, 1  ;;  %s1185_s15 = sphi %s1225_s15, %s14_s15  }
   0x2   : > { %p172_p1 = scmp.lt.s32.totalorder %s1185_s15, 3 }
   0x4   : > { %p173_p2 = pnand %p1005_p0, %p172_p1 }
   0x5   : > { %p203_p3 = scmp.lt.s32.totalorder (!%p173_p2), %s1001_s16, 1  ;;  %s1189_s21 = smov (!%p173_p2), 96  }
   0x6   : > { %176 = sbr.rel (%p173_p2) target bundleno = 2295 (0x8f7), region = 36  ;;  %s1190_s22 = smov (!%p173_p2), 120  }
   0x7   : > { %s1191_s23 = smov (!%p173_p2), 88   ;;  %s1192_s24 = smov (!%p173_p2), 64  }
   0x8   : > { %s1193_s25 = smov (!%p173_p2), 80   ;;  %s1194_s26 = smov (!%p173_p2), 112  }
   0x9   : > { %s1195_s29 = smov (!%p173_p2), 56   ;;  %s1196_s6 = smov (!%p173_p2), 72  }
   0xa   : > { %s1197_s7 = smov (!%p173_p2), 104   ;;  %s1198_s13 = smov (!%p173_p2), 48  }
   0xb   : > { %v1187_v0 = vmov 0.0   ;;  %vm1188_vm0 = vmmov 0   ;;  %s1365_s16 = smov (!%p203_p3, %s1001_s16), 1  ;;  %vm243_vm1 = vcmask 64512   ;;  %vm291_vm2 = vcmask 130048   ;;  %v221_v52 = vld [vmem:[%s1361_s2] sm:$0xff] }
   0xc   : > { %1054 = vmatprep.subr.bf16.mxu0 %v1187_v0  ;;  %1056 = vmatprep.mubr.msk.bf16.mxu0 %vm1188_vm0, %v1187_v0  ;;  %s1239_s17 = sshll.u32 %s1365_s16, 4  ;;  %vm367_vm3 = vcmask 1043456   ;;  %v363_v53 = vpack.c.bf16 %v221_v52, %v221_v52  ;;  %s1199_s18 = smov 40   ;;  %vm931_vm4 = vcmask 261120  }
   0xd   : > { %1060 = vmatprep.subr.bf16.mxu1 %v1187_v0  ;;  %1062 = vmatprep.mubr.msk.bf16.mxu1 %vm1188_vm0, %v1187_v0  ;;  %s207_s20 = scalar_lea.vmem %s1359_s0, %s1239_s17  ;;  %s212_s10 = scalar_lea.vmem %s1360_s1, %s1239_s17 }
   0xe   : > { %v219_v1 = vld [vmem:[%s207_s20] sm:$0xff]  ;;  %v220_v2 = vld [vmem:[%s207_s20 + $0x8] sm:$0xff]  ;;  %v369_v54 = vsel %vm367_vm3, %v363_v53, 0 }
   0xf   : > { %v1245_v3 = vpack.c.bf16 %v220_v2, %v219_v1  ;;  %v236_v4 = vmul.f32 0.35355338, %v219_v1  ;;  %v237_v5 = vmul.f32 0.35355338, %v220_v2 }
  0x11   : > { %241 = vrot.lane.b32.xlu0 %v1245_v3, %s1189_s21  ;;  %v1248_v6 = vpack.c.bf16 %v237_v5, %v236_v4 }
  0x13   : > { %415 = vrot.lane.b32.xlu1 %v1248_v6, %s1190_s22 }
  0x15   : > { %417 = vrot.lane.b32.xlu0 %v1245_v3, %s1191_s23  ;;  %s217_s23 = scalar_lea.vmem %s1363_s4, %s1239_s17 }
  0x83   : > { %v242_v7 = vpop.permute.xlu0 %241 }
  0x84   : > { %v248_v8 = vsel %vm243_vm1, %v242_v7, 0 }
  0x85   : > { %1055 = vmatpush3.bf16.xpose.msra.mxu0 %v248_v8  ;;  %v416_v11 = vpop.permute.xlu1 %415 }
  0x86   : > { %1072 = vmatprep.subr.bf16.mxu0 %v1187_v0 }
  0x87   : > { %v418_v9 = vpop.permute.xlu0 %417 }
  0x88   : > { %v423_v10 = vsel %vm243_vm1, %v418_v9, 0 }
  0x8c   : > { %1057 = vmatmul.mubr.msk.bf16.vlgmr.msra.gmra.mxu0 %vm243_vm1, %v1248_v6 }
  0x8d   : > { %1073 = vmatpush3.bf16.xpose.msra.mxu0 %v423_v10  ;;  %1074 = vmatprep.mubr.msk.bf16.mxu0 %vm1188_vm0, %v1187_v0  ;;  %v222_v10 = vld [vmem:[%s1361_s2 + $0x8] sm:$0xff] }
  0x8e   : > { %1084 = vmatprep.subr.bf16.mxu0 %v1187_v0 }
  0x94   : > { %1075 = vmatmul.mubr.msk.bf16.vlgmr.msra.gmra.mxu0 %vm243_vm1, %v416_v11  ;;  %v537_v11 = vpack.c.bf16 %v222_v10, %v222_v10 }
  0x95   : > { %1086 = vmatprep.mubr.msk.bf16.mxu0 %vm1188_vm0, %v1187_v0 }
 0x14c   : > { %v284_v12 = vpop.f32.mrf.mxu0 }
 0x14d   : > { %v292_v13 = vsel %vm291_vm2, %v284_v12, -inf }
 0x14e   : > { %293 = vmax.xlane.f32.xlu1 %v292_v13  ;;  %v1058_v14 = vpop.f32.mrf.mxu0 }
 0x150   : > { %v287_v15 = vpop.f32.mrf.mxu0 }
 0x151   : > { %v295_v16 = vsel %vm291_vm2, %v287_v15, -inf }
 0x152   : > { %296 = vmax.xlane.f32.xlu0 %v295_v16  ;;  %v1059_v17 = vpop.f32.mrf.mxu0 }
 0x154   : > { %v459_v18 = vpop.f32.mrf.mxu0 }
 0x155   : > { %v466_v32 = vsel %vm291_vm2, %v459_v18, -inf }
 0x156   : > { %v1076_v19 = vpop.f32.mrf.mxu0 }
 0x158   : > { %v462_v20 = vpop.f32.mrf.mxu0 }
 0x159   : > { %v469_v33 = vsel %vm291_vm2, %v462_v20, -inf }
 0x15a   : > { %v1077_v21 = vpop.f32.mrf.mxu0 }
 0x1d7   : > { %v294_v22 = vpop.xlane.xlu1 %293 }
 0x1d8   : > { %v298_v23 = vsub.f32 %v284_v12, %v294_v22  ;;  %v542_v12 = vsel %vm367_vm3, %v537_v11, 0 }
 0x1d9   : > { %1085 = vmatpush3.bf16.msra.mxu0 %v542_v12 }
 0x1da   : > { %v300_v24 = vmul.f32 1.442695, %v298_v23  ;;  %1096 = vmatprep.subr.bf16.mxu0 %v1187_v0 }
 0x1db   : > { %v297_v25 = vpop.xlane.xlu0 %296 }
 0x1dc   : > { %1147 = vpow2.f32 %v300_v24  ;;  %v299_v26 = vsub.f32 %v287_v15, %v297_v25 }
 0x1de   : > { %v302_v27 = vmul.f32 1.442695, %v299_v26 }
 0x1e0   : > { %1149 = vpow2.f32 %v302_v27 }
 0x1e9   : > { %v1148_v28 = vpop.eup %1147 }
 0x1ea   : > { %v304_v29 = vsel %vm291_vm2, %v1148_v28, 0.0 }
 0x1eb   : > { %305 = vadd.xlane.f32.xlu0 %v304_v29 }
 0x1ed   : > { %v1150_v30 = vpop.eup %1149 }
 0x1ee   : > { %v307_v31 = vsel %vm291_vm2, %v1150_v30, 0.0 }
 0x1ef   : > { %308 = vadd.xlane.f32.xlu1 %v307_v31 }
 0x1f3   : > { %467 = vmax.xlane.f32.xlu1 %v466_v32 }
 0x1f7   : > { %470 = vmax.xlane.f32.xlu1 %v469_v33 }
 0x201   : > { %315 = vrot.lane.b32.xlu0 %v1245_v3, %s1192_s24 }
 0x205   : > { %589 = vrot.lane.b32.xlu0 %v1245_v3, %s1193_s25 }
 0x209   : > { %587 = vrot.lane.b32.xlu0 %v1248_v6, %s1194_s26 }
 0x274   : > { %v306_v34 = vpop.xlane.xlu0 %305 }
 0x275   : > { %1151 = vrcp.f32 %v306_v34 }
 0x278   : > { %v309_v35 = vpop.xlane.xlu1 %308  ;;  %v316_v36 = vpop.permute.xlu0 %315 }
 0x279   : > { %1153 = vrcp.f32 %v309_v35  ;;  %1061 = vmatpush3.bf16.msra.mxu1 %v316_v36 }
 0x27a   : > { %1066 = vmatprep.subr.bf16.mxu1 %v1187_v0 }
 0x27c   : > { %v468_v37 = vpop.xlane.xlu1 %467  ;;  %v590_v4 = vpop.permute.xlu0 %589 }
 0x27d   : > { %v472_v38 = vsub.f32 %v459_v18, %v468_v37  ;;  %v595_v7 = vsel %vm243_vm1, %v590_v4, 0 }
 0x27f   : > { %v474_v39 = vmul.f32 1.442695, %v472_v38  ;;  %v1012_v38 = vld [vmem:[%s1362_s3] ss:$0 sm:$0xff] }
 0x280   : > { %v471_v40 = vpop.xlane.xlu1 %470  ;;  %v588_v9 = vpop.permute.xlu0 %587 }
 0x281   : > { %1155 = vpow2.f32 %v474_v39  ;;  %v473_v41 = vsub.f32 %v462_v20, %v471_v40  ;;  %v226_v40 = vld [vmem:[%s212_s10 + $0x8] sm:$0xff] }
 0x282   : > { %v1152_v43 = vpop.eup %1151 }
 0x283   : > { %v476_v42 = vmul.f32 1.442695, %v473_v41  ;;  %v312_v45 = vmul.f32 %v1152_v43, %v1148_v28 }
 0x285   : > { %1157 = vpow2.f32 %v476_v42  ;;  %v235_v42 = vadd.f32 %v1012_v38, %v226_v40 }
 0x286   : > { %v1154_v44 = vpop.eup %1153 }
 0x287   : > { %v313_v46 = vmul.f32 %v1154_v44, %v1150_v30 }
 0x289   : > { %v314_v47 = vpack.c.bf16 %v313_v46, %v312_v45 }
 0x28b   : > { %1063 = vmatmul.mubr.msk.bf16.vlgmr.msra.gmra.mxu1 %vm291_vm2, %v314_v47 }
 0x28c   : > { %1068 = vmatprep.mubr.msk.bf16.mxu1 %vm1188_vm0, %v1187_v0  ;;  %1067 = vmatpush3.bf16.msra.mxu1 %v369_v54 }
 0x28d   : > { %1078 = vmatprep.subr.bf16.mxu1 %v1187_v0 }
 0x28e   : > { %v1156_v48 = vpop.eup %1155 }
 0x28f   : > { %v478_v49 = vsel %vm291_vm2, %v1156_v48, 0.0 }
 0x290   : > { %479 = vadd.xlane.f32.xlu1 %v478_v49 }
 0x292   : > { %v1158_v50 = vpop.eup %1157 }
 0x293   : > { %v481_v51 = vsel %vm291_vm2, %v1158_v50, 0.0 }
 0x294   : > { %482 = vadd.xlane.f32.xlu1 %v481_v51 }
 0x2a5   : > { %489 = vrot.lane.b32.xlu1 %v1245_v3, %s1195_s29 }
 0x319   : > { %v480_v55 = vpop.xlane.xlu1 %479 }
 0x31d   : > { %v483_v56 = vpop.xlane.xlu1 %482 }
 0x31e   : > { %1159 = vrcp.f32 %v483_v56 }
 0x31f   : > { %1161 = vrcp.f32 %v480_v55 }
 0x321   : > { %v490_v61 = vpop.permute.xlu1 %489 }
 0x32b   : > { %v1160_v62 = vpop.eup %1159 }
 0x32c   : > { %v1162_v1 = vpop.eup %1161  ;;  %v487_v2 = vmul.f32 %v1160_v62, %v1158_v50 }
 0x32d   : > { %v486_v5 = vmul.f32 %v1162_v1, %v1156_v48 }
 0x32f   : > { %v488_v8 = vpack.c.bf16 %v487_v2, %v486_v5 }
 0x34b   : > { %v355_v57 = vpop.f32.mrf.mxu1 }
 0x34d   : > { %v1064_v58 = vpop.f32.mrf.mxu1 }
 0x34f   : > { %v358_v59 = vpop.f32.mrf.mxu1 }
 0x350   : > { %v362_v60 = vpack.c.bf16 %v358_v59, %v355_v57 }
 0x351   : > { %v1065_v63 = vpop.f32.mrf.mxu1 }
 0x352   : > { %1069 = vmatmul.mubr.msk.bf16.vlgmr.msra.gmra.mxu1 %vm243_vm1, %v362_v60 }
 0x353   : > { %1079 = vmatpush3.bf16.msra.mxu1 %v490_v61  ;;  %1080 = vmatprep.mubr.msk.bf16.mxu1 %vm1188_vm0, %v1187_v0  ;;  %v223_v61 = vld [vmem:[%s1361_s2 + $0x10] sm:$0xff] }
 0x354   : > { %1090 = vmatprep.subr.bf16.mxu1 %v1187_v0  ;;  %v709_v62 = vpack.c.bf16 %v223_v61, %v223_v61 }
 0x356   : > { %v714_v63 = vsel %vm367_vm3, %v709_v62, 0 }
 0x35a   : > { %1081 = vmatmul.mubr.msk.bf16.vlgmr.msra.gmra.mxu1 %vm291_vm2, %v488_v8 }
 0x35b   : > { %1091 = vmatpush3.bf16.xpose.msra.mxu1 %v595_v7  ;;  %1092 = vmatprep.mubr.msk.bf16.mxu1 %vm1188_vm0, %v1187_v0 }
 0x35c   : > { %1102 = vmatprep.subr.bf16.mxu1 %v1187_v0 }
 0x362   : > { %1093 = vmatmul.mubr.msk.bf16.vlgmr.msra.gmra.mxu1 %vm243_vm1, %v588_v9 }
 0x363   : > { %1104 = vmatprep.mubr.msk.bf16.mxu1 %vm1188_vm0, %v1187_v0  ;;  %1103 = vmatpush3.bf16.msra.mxu1 %v714_v63 }
 0x364   : > { %1114 = vmatprep.subr.bf16.mxu1 %v1187_v0 }
 0x412   : > { %v405_v13 = vpop.f32.mrf.mxu1 }
 0x414   : > { %v1070_v14 = vpop.f32.mrf.mxu1 }
 0x416   : > { %v408_v15 = vpop.f32.mrf.mxu1 }
 0x417   : > { %v413_v46 = vadd.f32 %v408_v15, %v235_v42 }
 0x418   : > { %v1071_v16 = vpop.f32.mrf.mxu1 }
 0x41a   : > { %v529_v17 = vpop.f32.mrf.mxu1 }
 0x41c   : > { %v1082_v18 = vpop.f32.mrf.mxu1 }
 0x41e   : > { %v532_v19 = vpop.f32.mrf.mxu1 }
 0x41f   : > { %v536_v20 = vpack.c.bf16 %v532_v19, %v529_v17 }
 0x420   : > { %v1083_v21 = vpop.f32.mrf.mxu1 }
 0x421   : > { %1087 = vmatmul.mubr.msk.bf16.vlgmr.msra.gmra.mxu0 %vm243_vm1, %v536_v20 }
 0x422   : > { %v631_v22 = vpop.f32.mrf.mxu1  ;;  %1098 = vmatprep.mubr.msk.bf16.mxu0 %vm1188_vm0, %v1187_v0 }
 0x423   : > { %v638_v23 = vsel %vm291_vm2, %v631_v22, -inf }
 0x424   : > { %639 = vmax.xlane.f32.xlu0 %v638_v23  ;;  %v1094_v24 = vpop.f32.mrf.mxu1 }
 0x426   : > { %v634_v25 = vpop.f32.mrf.mxu1 }
 0x427   : > { %v641_v26 = vsel %vm291_vm2, %v634_v25, -inf }
 0x428   : > { %642 = vmax.xlane.f32.xlu1 %v641_v26  ;;  %v1095_v27 = vpop.f32.mrf.mxu1 }
 0x439   : > { %761 = vrot.lane.b32.xlu1 %v1245_v3, %s1196_s6 }
 0x43d   : > { %759 = vrot.lane.b32.xlu1 %v1248_v6, %s1197_s7  ;;  %v225_v6 = vld [vmem:[%s212_s10] sm:$0xff] }
 0x43e   : > { %v234_v39 = vadd.f32 %v1012_v38, %v225_v6 }
 0x440   : > { %v412_v41 = vadd.f32 %v405_v13, %v234_v39 }
 0x4ad   : > { %v640_v28 = vpop.xlane.xlu0 %639 }
 0x4ae   : > { %v644_v29 = vsub.f32 %v631_v22, %v640_v28 }
 0x4b0   : > { %v646_v30 = vmul.f32 1.442695, %v644_v29 }
 0x4b1   : > { %v643_v31 = vpop.xlane.xlu1 %642 }
 0x4b2   : > { %1163 = vpow2.f32 %v646_v30  ;;  %v645_v32 = vsub.f32 %v634_v25, %v643_v31 }
 0x4b4   : > { %v648_v33 = vmul.f32 1.442695, %v645_v32 }
 0x4b5   : > { %v762_v55 = vpop.permute.xlu1 %761 }
 0x4b6   : > { %1165 = vpow2.f32 %v648_v33  ;;  %v767_v58 = vsel %vm243_vm1, %v762_v55, 0 }
 0x4b9   : > { %v760_v60 = vpop.permute.xlu1 %759 }
 0x4bf   : > { %v1164_v34 = vpop.eup %1163 }
 0x4c0   : > { %v650_v35 = vsel %vm291_vm2, %v1164_v34, 0.0 }
 0x4c1   : > { %651 = vadd.xlane.f32.xlu0 %v650_v35 }
 0x4c3   : > { %v1166_v36 = vpop.eup %1165 }
 0x4c4   : > { %v653_v37 = vsel %vm291_vm2, %v1166_v36, 0.0 }
 0x4c5   : > { %654 = vadd.xlane.f32.xlu0 %v653_v37 }
 0x4db   : > { %661 = vrot.lane.b32.xlu0 %v1245_v3, %s1198_s13 }
 0x4e1   : > { %v578_v43 = vpop.f32.mrf.mxu0 }
 0x4e2   : > { %v1318_v44 = vadd.f32 %v578_v43, %v412_v41 }
 0x4e3   : > { %v1088_v45 = vpop.f32.mrf.mxu0 }
 0x4e5   : > { %v581_v47 = vpop.f32.mrf.mxu0 }
 0x4e6   : > { %v1320_v48 = vadd.f32 %v581_v47, %v413_v46 }
 0x4e7   : > { %v1089_v49 = vpop.f32.mrf.mxu0 }
 0x54a   : > { %v652_v50 = vpop.xlane.xlu0 %651 }
 0x54b   : > { %1167 = vrcp.f32 %v652_v50 }
 0x54e   : > { %v655_v51 = vpop.xlane.xlu0 %654 }
 0x54f   : > { %1169 = vrcp.f32 %v655_v51 }
 0x552   : > { %v662_v52 = vpop.permute.xlu0 %661 }
 0x553   : > { %1097 = vmatpush3.bf16.msra.mxu0 %v662_v52 }
 0x554   : > { %1108 = vmatprep.subr.bf16.mxu0 %v1187_v0 }
 0x558   : > { %v1168_v53 = vpop.eup %1167 }
 0x559   : > { %v658_v56 = vmul.f32 %v1168_v53, %v1164_v34 }
 0x55c   : > { %v1170_v54 = vpop.eup %1169 }
 0x55d   : > { %v659_v57 = vmul.f32 %v1170_v54, %v1166_v36 }
 0x55f   : > { %v660_v59 = vpack.c.bf16 %v659_v57, %v658_v56 }
 0x561   : > { %1099 = vmatmul.mubr.msk.bf16.vlgmr.msra.gmra.mxu0 %vm291_vm2, %v660_v59 }
 0x562   : > { %1109 = vmatpush3.bf16.xpose.msra.mxu0 %v767_v58  ;;  %1110 = vmatprep.mubr.msk.bf16.mxu0 %vm1188_vm0, %v1187_v0 }
 0x563   : > { %1120 = vmatprep.subr.bf16.mxu0 %v1187_v0 }
 0x569   : > { %1111 = vmatmul.mubr.msk.bf16.vlgmr.msra.gmra.mxu0 %vm243_vm1, %v760_v60 }
 0x56a   : > { %1122 = vmatprep.mubr.msk.bf16.mxu0 %vm1188_vm0, %v1187_v0 }
 0x621   : > { %v701_v1 = vpop.f32.mrf.mxu0 }
 0x623   : > { %v1100_v2 = vpop.f32.mrf.mxu0 }
 0x625   : > { %v704_v4 = vpop.f32.mrf.mxu0 }
 0x626   : > { %v708_v5 = vpack.c.bf16 %v704_v4, %v701_v1 }
 0x627   : > { %v1101_v7 = vpop.f32.mrf.mxu0 }
 0x628   : > { %1105 = vmatmul.mubr.msk.bf16.vlgmr.msra.gmra.mxu1 %vm243_vm1, %v708_v5 }
 0x629   : > { %v803_v8 = vpop.f32.mrf.mxu0  ;;  %1116 = vmatprep.mubr.msk.bf16.mxu1 %vm1188_vm0, %v1187_v0 }
 0x62a   : > { %v810_v9 = vsel %vm291_vm2, %v803_v8, -inf }
 0x62b   : > { %811 = vmax.xlane.f32.xlu0 %v810_v9  ;;  %v1112_v10 = vpop.f32.mrf.mxu0 }
 0x62d   : > { %v806_v11 = vpop.f32.mrf.mxu0 }
 0x62e   : > { %v813_v12 = vsel %vm291_vm2, %v806_v11, -inf }
 0x62f   : > { %814 = vmax.xlane.f32.xlu1 %v813_v12  ;;  %v1113_v13 = vpop.f32.mrf.mxu0 }
 0x640   : > { %833 = vrot.lane.b32.xlu1 %v1245_v3, %s1199_s18  ;;  %v224_v3 = vld [vmem:[%s1361_s2 + $0x18] sm:$0xff] }
 0x641   : > { %v881_v26 = vpack.c.bf16 %v224_v3, %v224_v3 }
 0x643   : > { %v886_v28 = vsel %vm367_vm3, %v881_v26, 0 }
 0x644   : > { %1121 = vmatpush3.bf16.msra.mxu0 %v886_v28 }
 0x6b4   : > { %v812_v14 = vpop.xlane.xlu0 %811 }
 0x6b5   : > { %v816_v15 = vsub.f32 %v803_v8, %v812_v14 }
 0x6b7   : > { %v818_v16 = vmul.f32 1.442695, %v816_v15 }
 0x6b8   : > { %v815_v17 = vpop.xlane.xlu1 %814 }
 0x6b9   : > { %1171 = vpow2.f32 %v818_v16  ;;  %v817_v18 = vsub.f32 %v806_v11, %v815_v17 }
 0x6bb   : > { %v820_v19 = vmul.f32 1.442695, %v817_v18 }
 0x6bc   : > { %v834_v23 = vpop.permute.xlu1 %833 }
 0x6bd   : > { %1173 = vpow2.f32 %v820_v19  ;;  %1115 = vmatpush3.bf16.msra.mxu1 %v834_v23 }
 0x6c6   : > { %v1172_v0 = vpop.eup %1171 }
 0x6c7   : > { %v822_v20 = vsel %vm291_vm2, %v1172_v0, 0.0 }
 0x6c8   : > { %823 = vadd.xlane.f32.xlu0 %v822_v20 }
 0x6ca   : > { %v1174_v21 = vpop.eup %1173 }
 0x6cb   : > { %v825_v22 = vsel %vm291_vm2, %v1174_v21, 0.0 }
 0x6cc   : > { %826 = vadd.xlane.f32.xlu0 %v825_v22 }
 0x6e8   : > { %v750_v24 = vpop.f32.mrf.mxu1 }
 0x6e9   : > { %v757_v25 = vadd.f32 %v750_v24, %v1318_v44 }
 0x6ea   : > { %v1106_v27 = vpop.f32.mrf.mxu1 }
 0x6ec   : > { %v753_v29 = vpop.f32.mrf.mxu1 }
 0x6ed   : > { %v758_v30 = vadd.f32 %v753_v29, %v1320_v48 }
 0x6ee   : > { %v1107_v31 = vpop.f32.mrf.mxu1 }
 0x751   : > { %v824_v32 = vpop.xlane.xlu0 %823 }
 0x752   : > { %1175 = vrcp.f32 %v824_v32 }
 0x755   : > { %v827_v33 = vpop.xlane.xlu0 %826 }
 0x756   : > { %1177 = vrcp.f32 %v827_v33 }
 0x75f   : > { %v1176_v34 = vpop.eup %1175 }
 0x760   : > { %v830_v37 = vmul.f32 %v1176_v34, %v1172_v0 }
 0x763   : > { %v1178_v35 = vpop.eup %1177 }
 0x764   : > { %v831_v36 = vmul.f32 %v1178_v35, %v1174_v21 }
 0x766   : > { %v832_v6 = vpack.c.bf16 %v831_v36, %v830_v37 }
 0x768   : > { %1117 = vmatmul.mubr.msk.bf16.vlgmr.msra.gmra.mxu1 %vm291_vm2, %v832_v6 }
 0x828   : > { %v873_v38 = vpop.f32.mrf.mxu1 }
 0x82a   : > { %v1118_v39 = vpop.f32.mrf.mxu1 }
 0x82c   : > { %v876_v40 = vpop.f32.mrf.mxu1 }
 0x82d   : > { %v880_v41 = vpack.c.bf16 %v876_v40, %v873_v38 }
 0x82e   : > { %v1119_v42 = vpop.f32.mrf.mxu1 }
 0x82f   : > { %1123 = vmatmul.mubr.msk.bf16.vlgmr.msra.gmra.mxu0 %vm243_vm1, %v880_v41 }
 0x8ef   : > { %v922_v43 = vpop.f32.mrf.mxu0 }
 0x8f0   : > { %v929_v44 = vadd.f32 %v922_v43, %v757_v25 }
 0x8f1   : > { %v1124_v45 = vpop.f32.mrf.mxu0 }
 0x8f2   : > { %932 = vst.msk [vmem:[%s217_s23] sm:$0xff] %vm931_vm4, %v929_v44 }
 0x8f3   : > { %v925_v46 = vpop.f32.mrf.mxu0 }
 0x8f4   : > { %v930_v47 = vadd.f32 %v925_v46, %v758_v30 }
 0x8f5   : > { %v1125_v48 = vpop.f32.mrf.mxu0 }
 0x8f6   : > { %933 = vst.msk [vmem:[%s217_s23 + $0x8] sm:$0xff] %vm931_vm4, %v930_v47 }
 0x8f7 PF: > { %s14_s15 = sadd.s32 1, %s1185_s15  }
 0x8f8   : > { %p11_p4 = scmp.ge.s32.totalorder %s14_s15, 4  }
 0x8fa   :  { %13 = sbr.rel (!%p11_p4) target bundleno = 1 (0x1), region = 69 }

// kernel: _lambda_.13
= control target key start
LH: loop header
LB: loop body
LE: loop exit
PB: predicated region body
PF: predicated region fallthrough
CT: control target
= control target key end

     0   :  { %vm25_vm0 = vcmask 261120   ;;  %vm207_vm1 = vcmask 523264   ;;  %s338_s0 = inlined_call_operand.vmem [shape: f32[32,32], index: 0, kind: input, shape index: {}]   ;;  %s339_s3 = inlined_call_operand.vmem [shape: f32[32,64], index: 3, kind: input, shape index: {}]   ;;  %s340_s1 = inlined_call_operand.vmem [shape: f32[1,32], index: 1, kind: input, shape index: {}]   ;;  %s341_s2 = inlined_call_operand.vmem [shape: f32[1,32], index: 2, kind: input, shape index: {}]   ;;  %s342_s4 = inlined_call_operand.vmem [shape: f32[1,64], index: 4, kind: input, shape index: {}]   ;;  %s343_s5 = inlined_call_operand.vmem [shape: f32[32,64], index: 5, kind: output, shape index: {}]  }
   0x1   :  { %v21_v0 = vld [vmem:[%s338_s0] sm:$0xff]  ;;  %v23_v1 = vld [vmem:[%s338_s0 + $0x10] sm:$0xff]  ;;  %v22_v2 = vld [vmem:[%s338_s0 + $0x8] sm:$0xff] }
   0x2   :  { %v26_v3 = vsel %vm25_vm0, %v21_v0, 0.0  ;;  %v32_v4 = vsel %vm25_vm0, %v23_v1, 0.0  ;;  %v24_v5 = vld [vmem:[%s338_s0 + $0x18] sm:$0xff]  ;;  %v29_v6 = vsel %vm25_vm0, %v22_v2, 0.0  ;;  %v103_v28 = vld [vmem:[%s339_s3 + $0x10] sm:$0xff]  ;;  %v101_v30 = vld [vmem:[%s339_s3] sm:$0xff] }
   0x3   :  { %27 = vadd.xlane.f32.xlu0 %v26_v3  ;;  %33 = vadd.xlane.f32.xlu1 %v32_v4  ;;  %v35_v7 = vsel %vm25_vm0, %v24_v5, 0.0  ;;  %v104_v29 = vld [vmem:[%s339_s3 + $0x18] sm:$0xff]  ;;  %v102_v32 = vld [vmem:[%s339_s3 + $0x8] sm:$0xff]  ;;  %v216_v48 = vld [vmem:[%s340_s1] ss:$0 sm:$0xff] }
   0x4   :  { %v108_v31 = vpack.c.bf16 %v104_v29, %v103_v28  ;;  %v107_v33 = vpack.c.bf16 %v102_v32, %v101_v30  ;;  %v217_v53 = vld [vmem:[%s341_s2] ss:$0 sm:$0xff] }
   0x6   :  { %225 = vmatprep.subr.bf16.mxu0 %v108_v31 }
   0x7   :  { %30 = vadd.xlane.f32.xlu0 %v29_v6  ;;  %36 = vadd.xlane.f32.xlu1 %v35_v7 }
   0x8   :  { %226 = vmatpush3.bf16.msra.mxu0 %v108_v31 }
   0x9   :  { %227 = vmatprep.subr.bf16.mxu0 %v107_v33 }
   0xc   :  { %228 = vmatpush3.bf16.msra.mxu0 %v107_v33 }
  0x8c   :  { %v28_v8 = vpop.xlane.xlu0 %27  ;;  %v34_v9 = vpop.xlane.xlu1 %33 }
  0x8d   :  { %v39_v10 = vmul.f32 0.03125, %v28_v8  ;;  %v41_v11 = vmul.f32 0.03125, %v34_v9 }
  0x8f   :  { %v43_v12 = vsub.f32 %v21_v0, %v39_v10  ;;  %v45_v13 = vsub.f32 %v23_v1, %v41_v11 }
  0x90   :  { %v31_v14 = vpop.xlane.xlu0 %30  ;;  %v37_v15 = vpop.xlane.xlu1 %36 }
  0x91   :  { %v40_v16 = vmul.f32 0.03125, %v31_v14  ;;  %v42_v17 = vmul.f32 0.03125, %v37_v15  ;;  %v47_v18 = vmul.f32 %v43_v12, %v43_v12  ;;  %v49_v19 = vmul.f32 %v45_v13, %v45_v13 }
  0x93   :  { %v44_v20 = vsub.f32 %v22_v2, %v40_v16  ;;  %v46_v21 = vsub.f32 %v24_v5, %v42_v17  ;;  %v51_v22 = vsel %vm25_vm0, %v47_v18, 0.0  ;;  %v57_v23 = vsel %vm25_vm0, %v49_v19, 0.0  ;;  %v218_v2 = vld [vmem:[%s342_s4] ss:$0 sm:$0xff] }
  0x94   :  { %52 = vadd.xlane.f32.xlu0 %v51_v22 }
  0x95   :  { %v48_v24 = vmul.f32 %v44_v20, %v44_v20  ;;  %v50_v25 = vmul.f32 %v46_v21, %v46_v21 }
  0x97   :  { %v54_v26 = vsel %vm25_vm0, %v48_v24, 0.0  ;;  %v60_v27 = vsel %vm25_vm0, %v50_v25, 0.0 }
  0x98   :  { %58 = vadd.xlane.f32.xlu0 %v57_v23  ;;  %55 = vadd.xlane.f32.xlu1 %v54_v26 }
  0x9c   :  { %61 = vadd.xlane.f32.xlu1 %v60_v27 }
 0x11d   :  { %v53_v34 = vpop.xlane.xlu0 %52 }
 0x11e   :  { %v63_v35 = vmul.f32 0.03125, %v53_v34 }
 0x120   :  { %v67_v36 = vadd.f32 1e-05, %v63_v35 }
 0x121   :  { %v56_v37 = vpop.xlane.xlu1 %55  ;;  %v59_v38 = vpop.xlane.xlu0 %58 }
 0x122   :  { %233 = vrsqrt.f32 %v67_v36  ;;  %v64_v39 = vmul.f32 0.03125, %v56_v37  ;;  %v65_v40 = vmul.f32 0.03125, %v59_v38 }
 0x124   :  { %v68_v41 = vadd.f32 1e-05, %v64_v39  ;;  %v69_v42 = vadd.f32 1e-05, %v65_v40 }
 0x125   :  { %v62_v43 = vpop.xlane.xlu1 %61 }
 0x126   :  { %235 = vrsqrt.f32 %v68_v41  ;;  %v66_v44 = vmul.f32 0.03125, %v62_v43 }
 0x127   :  { %237 = vrsqrt.f32 %v69_v42 }
 0x128   :  { %v70_v45 = vadd.f32 1e-05, %v66_v44 }
 0x12a   :  { %239 = vrsqrt.f32 %v70_v45 }
 0x12f   :  { %v234_v46 = vpop.eup %233 }
 0x130   :  { %v75_v47 = vmul.f32 %v234_v46, %v43_v12 }
 0x132   :  { %v86_v52 = vmul.f32 %v216_v48, %v75_v47 }
 0x133   :  { %v236_v49 = vpop.eup %235 }
 0x134   :  { %v238_v50 = vpop.eup %237  ;;  %v76_v51 = vmul.f32 %v236_v49, %v44_v20  ;;  %v97_v57 = vadd.f32 %v217_v53, %v86_v52 }
 0x135   :  { %v77_v54 = vmul.f32 %v238_v50, %v45_v13 }
 0x136   :  { %v87_v55 = vmul.f32 %v216_v48, %v76_v51 }
 0x137   :  { %v240_v56 = vpop.eup %239  ;;  %v88_v60 = vmul.f32 %v216_v48, %v77_v54 }
 0x138   :  { %v98_v58 = vadd.f32 %v217_v53, %v87_v55  ;;  %v78_v59 = vmul.f32 %v240_v56, %v46_v21 }
 0x139   :  { %v99_v63 = vadd.f32 %v217_v53, %v88_v60 }
 0x13a   :  { %v105_v61 = vpack.c.bf16 %v98_v58, %v97_v57  ;;  %v89_v62 = vmul.f32 %v216_v48, %v78_v59 }
 0x13c   :  { %229 = vmatprep.mubr.msk.bf16.mxu0 %vm25_vm0, %v105_v61  ;;  %v100_v0 = vadd.f32 %v217_v53, %v89_v62 }
 0x13e   :  { %v106_v1 = vpack.c.bf16 %v100_v0, %v99_v63 }
 0x140   :  { %230 = vmatmul.mubr.msk.bf16.vlgmr.msra.gmra.mxu0 %vm25_vm0, %v106_v1 }
 0x200   :  { %v231_v3 = vpop.f32.mrf.mxu0 }
 0x201   :  { %v165_v4 = vadd.f32 %v231_v3, %v218_v2 }
 0x202   :  { %v156_v5 = vpop.f32.mrf.mxu0 }
 0x203   :  { %v177_v6 = vmul.f32 0.044715, %v165_v4  ;;  %v157_v7 = vadd.f32 %v218_v2, %v156_v5  ;;  %v173_v32 = vmul.f32 0.5, %v165_v4 }
 0x204   :  { %v232_v8 = vpop.f32.mrf.mxu0 }
 0x205   :  { %v181_v9 = vmul.f32 %v177_v6, %v165_v4  ;;  %v175_v10 = vmul.f32 0.044715, %v157_v7  ;;  %v168_v11 = vadd.f32 %v232_v8, %v218_v2  ;;  %v171_v36 = vmul.f32 0.5, %v157_v7 }
 0x206   :  { %v159_v12 = vpop.f32.mrf.mxu0 }
 0x207   :  { %v185_v13 = vmul.f32 %v181_v9, %v165_v4  ;;  %v179_v14 = vmul.f32 %v175_v10, %v157_v7  ;;  %v178_v15 = vmul.f32 0.044715, %v168_v11  ;;  %v160_v16 = vadd.f32 %v218_v2, %v159_v12 }
 0x208   :  { %v174_v40 = vmul.f32 0.5, %v168_v11 }
 0x209   :  { %v189_v17 = vadd.f32 %v185_v13, %v165_v4  ;;  %v183_v18 = vmul.f32 %v179_v14, %v157_v7  ;;  %v182_v19 = vmul.f32 %v178_v15, %v168_v11  ;;  %v176_v20 = vmul.f32 0.044715, %v160_v16 }
 0x20a   :  { %v172_v44 = vmul.f32 0.5, %v160_v16 }
 0x20b   :  { %v193_v21 = vmul.f32 0.7978846, %v189_v17  ;;  %v187_v22 = vadd.f32 %v183_v18, %v157_v7  ;;  %v186_v23 = vmul.f32 %v182_v19, %v168_v11  ;;  %v180_v24 = vmul.f32 %v176_v20, %v160_v16 }
 0x20d   :  { %241 = vtanh.f32 %v193_v21  ;;  %v191_v25 = vmul.f32 0.7978846, %v187_v22  ;;  %v190_v26 = vadd.f32 %v186_v23, %v168_v11  ;;  %v184_v27 = vmul.f32 %v180_v24, %v160_v16 }
 0x20f   :  { %243 = vtanh.f32 %v191_v25  ;;  %v194_v28 = vmul.f32 0.7978846, %v190_v26  ;;  %v188_v29 = vadd.f32 %v184_v27, %v160_v16 }
 0x211   :  { %245 = vtanh.f32 %v194_v28  ;;  %v192_v30 = vmul.f32 0.7978846, %v188_v29 }
 0x213   :  { %247 = vtanh.f32 %v192_v30 }
 0x21a   :  { %v242_v31 = vpop.eup %241 }
 0x21b   :  { %v201_v33 = vadd.f32 1.0, %v242_v31 }
 0x21c   :  { %v244_v34 = vpop.eup %243 }
 0x21d   :  { %v205_v35 = vmul.f32 %v201_v33, %v173_v32  ;;  %v199_v37 = vadd.f32 1.0, %v244_v34 }
 0x21e   :  { %v246_v38 = vpop.eup %245 }
 0x21f   :  { %210 = vst.msk [vmem:[%s343_s5 + $0x10] sm:$0xff] %vm207_vm1, %v205_v35  ;;  %v203_v39 = vmul.f32 %v199_v37, %v171_v36  ;;  %v202_v41 = vadd.f32 1.0, %v246_v38 }
 0x220   :  { %v248_v42 = vpop.eup %247 }
 0x221   :  { %208 = vst.msk [vmem:[%s343_s5] sm:$0xff] %vm207_vm1, %v203_v39  ;;  %v206_v43 = vmul.f32 %v202_v41, %v174_v40  ;;  %v200_v45 = vadd.f32 1.0, %v248_v42 }
 0x223   :  { %211 = vst.msk [vmem:[%s343_s5 + $0x18] sm:$0xff] %vm207_vm1, %v206_v43  ;;  %v204_v46 = vmul.f32 %v200_v45, %v172_v44 }
 0x225   :  { %209 = vst.msk [vmem:[%s343_s5 + $0x8] sm:$0xff] %vm207_vm1, %v204_v46 }

// kernel: _lambda_.19
= control target key start
LH: loop header
LB: loop body
LE: loop exit
PB: predicated region body
PF: predicated region fallthrough
CT: control target
= control target key end

     0   :  { %vm25_vm0 = vcmask 261120   ;;  %vm171_vm1 = vcmask 523264   ;;  %s290_s0 = inlined_call_operand.vmem [shape: f32[32,32], index: 0, kind: input, shape index: {}]   ;;  %s291_s3 = inlined_call_operand.vmem [shape: f32[32,64], index: 3, kind: input, shape index: {}]   ;;  %s292_s1 = inlined_call_operand.vmem [shape: f32[1,32], index: 1, kind: input, shape index: {}]   ;;  %s293_s2 = inlined_call_operand.vmem [shape: f32[1,32], index: 2, kind: input, shape index: {}]   ;;  %s294_s4 = inlined_call_operand.vmem [shape: f32[1,64], index: 4, kind: input, shape index: {}]   ;;  %s295_s5 = inlined_call_operand.vmem [shape: f32[32,64], index: 5, kind: output, shape index: {}]  }
   0x1   :  { %v21_v0 = vld [vmem:[%s290_s0] sm:$0xff]  ;;  %v23_v1 = vld [vmem:[%s290_s0 + $0x10] sm:$0xff]  ;;  %v22_v2 = vld [vmem:[%s290_s0 + $0x8] sm:$0xff] }
   0x2   :  { %v26_v3 = vsel %vm25_vm0, %v21_v0, 0.0  ;;  %v32_v4 = vsel %vm25_vm0, %v23_v1, 0.0  ;;  %v24_v5 = vld [vmem:[%s290_s0 + $0x18] sm:$0xff]  ;;  %v29_v6 = vsel %vm25_vm0, %v22_v2, 0.0  ;;  %v103_v28 = vld [vmem:[%s291_s3 + $0x10] sm:$0xff]  ;;  %v101_v30 = vld [vmem:[%s291_s3] sm:$0xff] }
   0x3   :  { %27 = vadd.xlane.f32.xlu0 %v26_v3  ;;  %33 = vadd.xlane.f32.xlu1 %v32_v4  ;;  %v35_v7 = vsel %vm25_vm0, %v24_v5, 0.0  ;;  %v104_v29 = vld [vmem:[%s291_s3 + $0x18] sm:$0xff]  ;;  %v102_v32 = vld [vmem:[%s291_s3 + $0x8] sm:$0xff]  ;;  %v180_v48 = vld [vmem:[%s292_s1] ss:$0 sm:$0xff] }
   0x4   :  { %v108_v31 = vpack.c.bf16 %v104_v29, %v103_v28  ;;  %v107_v33 = vpack.c.bf16 %v102_v32, %v101_v30  ;;  %v181_v53 = vld [vmem:[%s293_s2] ss:$0 sm:$0xff] }
   0x6   :  { %189 = vmatprep.subr.bf16.mxu0 %v108_v31 }
   0x7   :  { %30 = vadd.xlane.f32.xlu0 %v29_v6  ;;  %36 = vadd.xlane.f32.xlu1 %v35_v7 }
   0x8   :  { %190 = vmatpush3.bf16.msra.mxu0 %v108_v31 }
   0x9   :  { %191 = vmatprep.subr.bf16.mxu0 %v107_v33 }
   0xc   :  { %192 = vmatpush3.bf16.msra.mxu0 %v107_v33 }
  0x8c   :  { %v28_v8 = vpop.xlane.xlu0 %27  ;;  %v34_v9 = vpop.xlane.xlu1 %33 }
  0x8d   :  { %v39_v10 = vmul.f32 0.03125, %v28_v8  ;;  %v41_v11 = vmul.f32 0.03125, %v34_v9 }
  0x8f   :  { %v43_v12 = vsub.f32 %v21_v0, %v39_v10  ;;  %v45_v13 = vsub.f32 %v23_v1, %v41_v11 }
  0x90   :  { %v31_v14 = vpop.xlane.xlu0 %30  ;;  %v37_v15 = vpop.xlane.xlu1 %36 }
  0x91   :  { %v40_v16 = vmul.f32 0.03125, %v31_v14  ;;  %v42_v17 = vmul.f32 0.03125, %v37_v15  ;;  %v47_v18 = vmul.f32 %v43_v12, %v43_v12  ;;  %v49_v19 = vmul.f32 %v45_v13, %v45_v13 }
  0x93   :  { %v44_v20 = vsub.f32 %v22_v2, %v40_v16  ;;  %v46_v21 = vsub.f32 %v24_v5, %v42_v17  ;;  %v51_v22 = vsel %vm25_vm0, %v47_v18, 0.0  ;;  %v57_v23 = vsel %vm25_vm0, %v49_v19, 0.0  ;;  %v182_v2 = vld [vmem:[%s294_s4] ss:$0 sm:$0xff] }
  0x94   :  { %52 = vadd.xlane.f32.xlu0 %v51_v22 }
  0x95   :  { %v48_v24 = vmul.f32 %v44_v20, %v44_v20  ;;  %v50_v25 = vmul.f32 %v46_v21, %v46_v21 }
  0x97   :  { %v54_v26 = vsel %vm25_vm0, %v48_v24, 0.0  ;;  %v60_v27 = vsel %vm25_vm0, %v50_v25, 0.0 }
  0x98   :  { %58 = vadd.xlane.f32.xlu0 %v57_v23  ;;  %55 = vadd.xlane.f32.xlu1 %v54_v26 }
  0x9c   :  { %61 = vadd.xlane.f32.xlu1 %v60_v27 }
 0x11d   :  { %v53_v34 = vpop.xlane.xlu0 %52 }
 0x11e   :  { %v63_v35 = vmul.f32 0.03125, %v53_v34 }
 0x120   :  { %v67_v36 = vadd.f32 1e-05, %v63_v35 }
 0x121   :  { %v56_v37 = vpop.xlane.xlu1 %55  ;;  %v59_v38 = vpop.xlane.xlu0 %58 }
 0x122   :  { %197 = vrsqrt.f32 %v67_v36  ;;  %v64_v39 = vmul.f32 0.03125, %v56_v37  ;;  %v65_v40 = vmul.f32 0.03125, %v59_v38 }
 0x124   :  { %v68_v41 = vadd.f32 1e-05, %v64_v39  ;;  %v69_v42 = vadd.f32 1e-05, %v65_v40 }
 0x125   :  { %v62_v43 = vpop.xlane.xlu1 %61 }
 0x126   :  { %199 = vrsqrt.f32 %v68_v41  ;;  %v66_v44 = vmul.f32 0.03125, %v62_v43 }
 0x127   :  { %201 = vrsqrt.f32 %v69_v42 }
 0x128   :  { %v70_v45 = vadd.f32 1e-05, %v66_v44 }
 0x12a   :  { %203 = vrsqrt.f32 %v70_v45 }
 0x12f   :  { %v198_v46 = vpop.eup %197 }
 0x130   :  { %v75_v47 = vmul.f32 %v198_v46, %v43_v12 }
 0x132   :  { %v86_v52 = vmul.f32 %v180_v48, %v75_v47 }
 0x133   :  { %v200_v49 = vpop.eup %199 }
 0x134   :  { %v202_v50 = vpop.eup %201  ;;  %v76_v51 = vmul.f32 %v200_v49, %v44_v20  ;;  %v97_v57 = vadd.f32 %v181_v53, %v86_v52 }
 0x135   :  { %v77_v54 = vmul.f32 %v202_v50, %v45_v13 }
 0x136   :  { %v87_v55 = vmul.f32 %v180_v48, %v76_v51 }
 0x137   :  { %v204_v56 = vpop.eup %203  ;;  %v88_v60 = vmul.f32 %v180_v48, %v77_v54 }
 0x138   :  { %v98_v58 = vadd.f32 %v181_v53, %v87_v55  ;;  %v78_v59 = vmul.f32 %v204_v56, %v46_v21 }
 0x139   :  { %v99_v63 = vadd.f32 %v181_v53, %v88_v60 }
 0x13a   :  { %v105_v61 = vpack.c.bf16 %v98_v58, %v97_v57  ;;  %v89_v62 = vmul.f32 %v180_v48, %v78_v59 }
 0x13c   :  { %193 = vmatprep.mubr.msk.bf16.mxu0 %vm25_vm0, %v105_v61  ;;  %v100_v0 = vadd.f32 %v181_v53, %v89_v62 }
 0x13e   :  { %v106_v1 = vpack.c.bf16 %v100_v0, %v99_v63 }
 0x140   :  { %194 = vmatmul.mubr.msk.bf16.vlgmr.msra.gmra.mxu0 %vm25_vm0, %v106_v1 }
 0x200   :  { %v195_v3 = vpop.f32.mrf.mxu0 }
 0x201   :  { %v165_v4 = vadd.f32 %v195_v3, %v182_v2 }
 0x202   :  { %v156_v5 = vpop.f32.mrf.mxu0 }
 0x203   :  { %174 = vst.msk [vmem:[%s295_s5 + $0x10] sm:$0xff] %vm171_vm1, %v165_v4  ;;  %v157_v6 = vadd.f32 %v182_v2, %v156_v5 }
 0x204   :  { %v196_v7 = vpop.f32.mrf.mxu0 }
 0x205   :  { %172 = vst.msk [vmem:[%s295_s5] sm:$0xff] %vm171_vm1, %v157_v6  ;;  %v168_v8 = vadd.f32 %v196_v7, %v182_v2 }
 0x206   :  { %v159_v9 = vpop.f32.mrf.mxu0 }
 0x207   :  { %175 = vst.msk [vmem:[%s295_s5 + $0x18] sm:$0xff] %vm171_vm1, %v168_v8  ;;  %v160_v10 = vadd.f32 %v182_v2, %v159_v9 }
 0x209   :  { %173 = vst.msk [vmem:[%s295_s5 + $0x8] sm:$0xff] %vm171_vm1, %v160_v10 }

</bundles_post_ra>
